<compile_context>
chip_gen: v7x
topology: tpu7x:2x2x1
jax: 0.10.0
libtpu: 0.0.40
codegen_flags: <defaults>
</compile_context>

<pallas_src>
import math

import jax
import jax.numpy as jnp
import numpy as np
from jax.experimental import pallas as pl
from jax.experimental.pallas import tpu as pltpu

# ----------------------------- configuration -------------------------------
N = 64                       # points per cloud
K = 8                        # neighbours per point
L = K * N                    # 512 flattened neighbour rows (lane axis, K-major)
C_IN = 4                     # in_channels (head)
EMB_IN = 3 + C_IN            # 7
H1 = (64 // 2) // 2          # embed_hidden_channels // 2 = 16
H2 = 64 // 2                 # embed_hidden_channels      = 32
C_OUT = 64                   # out_channels = channel_list[0]
BN_EPS = 1e-5
HEAD_BN_GAMMA = 0.8          # nn.init.constant_(self.bn.weight, 0.8)
CHUNK = 128                  # lane-chunk for building the selection matrix
_INV_SQRT2 = 1.0 / math.sqrt(2.0)


# ----------------------------- kernel helpers ------------------------------
def _bn_lanes(x, gamma):
    """BatchNorm1d (training mode, biased var) over the lane ("batch") axis."""
    mean = jnp.mean(x, axis=1, keepdims=True)
    cen = x - mean
    var = jnp.mean(cen * cen, axis=1, keepdims=True)
    return gamma * cen * jax.lax.rsqrt(var + BN_EPS)


def _erf_poly(x):
    """erf via Abramowitz-Stegun 7.1.26 (|err| <= 1.5e-7); divide on the EUP."""
    a1, a2, a3, a4, a5 = 0.254829592, -0.284496736, 1.421413741, -1.453152027, 1.061405429
    pp = 0.3275911
    sgn = jnp.where(x >= 0.0, 1.0, -1.0)
    z = jnp.abs(x)
    t = pl.reciprocal(1.0 + pp * z, approx=True)      # EUP slot, frees VALU
    poly = ((((a5 * t + a4) * t + a3) * t + a2) * t + a1) * t
    return sgn * (1.0 - poly * jnp.exp(-z * z))


def _gelu_exact(x):
    """nn.GELU() default (erf form)."""
    return 0.5 * x * (1.0 + _erf_poly(x * _INV_SQRT2))


# ----------------------------- the kernel -----------------------------------
def _local_fusion_kernel(pft_ref, idx_ref, w1_ref, w2_ref, w3_ref, o_ref, c_ref):
    # Per-cloud refs:
    #   pft_ref [7, 2N] bf16 : cols 0..N-1 = [p|f]^T, cols N..2N-1 = [p|0]^T
    #   idx_ref [1, L]  i32  : neighbour source index per lane (K-major, l = k*N + n)
    #   w1/w2/w3             : PyTorch [out, in] layouts, bf16
    #   o_ref   [C_OUT, N] f32
    #   c_ref   [2N, L] bf16 : scratch for the fused gather / centre-subtract matrix

    # centre column per lane (second half of the contraction axis); constant
    # across 128-lane chunks because 128 is a multiple of N = 64.
    ctr_row = jax.lax.broadcasted_iota(jnp.int32, (1, CHUNK), 1) % N + N

    # Build C in 128-lane chunks (bounded vreg live ranges), bf16 in VMEM scratch.
    def build_chunk(c, carry):
        lo = pl.multiple_of(c * CHUNK, CHUNK)
        idx_c = idx_ref[:, pl.ds(lo, CHUNK)]                         # [1, CHUNK]
        r = jax.lax.broadcasted_iota(jnp.int32, (2 * N, CHUNK), 0)   # row id
        selv = jnp.where(r == idx_c, 1.0, jnp.where(r == ctr_row, -1.0, 0.0))
        c_ref[:, pl.ds(lo, CHUNK)] = selv.astype(jnp.bfloat16)
        return carry

    jax.lax.fori_loop(0, L // CHUNK, build_chunk, 0)

    # Fused gather + relative coords: single [7,128] x [128,512] bf16 MXU matmul.
    x = jnp.dot(pft_ref[...], c_ref[...], preferred_element_type=jnp.float32)   # [7, L]

    # embed MLP in the transposed, lane-dense orientation: h^T = W @ x^T.
    # bf16 MXU operands + f32 accumulation; BN/GELU elementwise stays f32 (v5e-safe).
    h = jnp.dot(w1_ref[...], x.astype(jnp.bfloat16),
                preferred_element_type=jnp.float32)                  # [16, L]
    h = _gelu_exact(_bn_lanes(h, 1.0))
    h = jnp.dot(w2_ref[...], h.astype(jnp.bfloat16),
                preferred_element_type=jnp.float32)                  # [32, L]
    h = _gelu_exact(_bn_lanes(h, 1.0))
    h = jnp.dot(w3_ref[...], h.astype(jnp.bfloat16),
                preferred_element_type=jnp.float32)                  # [64, L]

    # max over the K neighbours: log2(K)=3 lane-halving maxima (trace-time unroll)
    g = h
    half = L
    while half > N:
        half //= 2
        g = jnp.maximum(g[:, :half], g[:, half:])                    # -> [C_OUT, N]

    # final BatchNorm1d (head init gamma = 0.8, beta = 0), stats over the N points
    o_ref[...] = _bn_lanes(g, HEAD_BN_GAMMA)


# ----------------------------- wrapper ---------------------------------------
def _forward_batched_impl(p, f, group_idx, w1, w2, w3):
    """p: [B,N,3], f: [B,N,C_IN], group_idx: [B,N,K] -> [B,N,C_OUT]."""
    b = p.shape[0]
    p_t = jnp.swapaxes(p.astype(jnp.float32), 1, 2)                  # [B, 3, N]
    f_t = jnp.swapaxes(f.astype(jnp.float32), 1, 2)                  # [B, C_IN, N]
    top = jnp.concatenate([p_t, f_t], axis=1)                        # [p|f]^T
    bot = jnp.concatenate([p_t, jnp.zeros_like(f_t)], axis=1)        # [p|0]^T
    pft_aug = jnp.concatenate([top, bot], axis=2).astype(jnp.bfloat16)   # [B, 7, 2N]
    idx = jnp.swapaxes(group_idx.astype(jnp.int32), 1, 2).reshape(b, 1, L)  # K-major

    out_t = pl.pallas_call(
        _local_fusion_kernel,
        out_shape=jax.ShapeDtypeStruct((b, C_OUT, N), jnp.float32),
        grid=(b,),
        in_specs=[
            pl.BlockSpec((None, EMB_IN, 2 * N), lambda i: (i, 0, 0)),
            pl.BlockSpec((None, 1, L), lambda i: (i, 0, 0)),
            pl.BlockSpec((H1, EMB_IN), lambda i: (0, 0)),
            pl.BlockSpec((H2, H1), lambda i: (0, 0)),
            pl.BlockSpec((C_OUT, H2), lambda i: (0, 0)),
        ],
        out_specs=pl.BlockSpec((None, C_OUT, N), lambda i: (i, 0, 0)),
        scratch_shapes=[pltpu.VMEM((2 * N, L), jnp.bfloat16)],
        compiler_params=pltpu.CompilerParams(
            dimension_semantics=("parallel",)),
    )(pft_aug, idx,
      w1.astype(jnp.bfloat16), w2.astype(jnp.bfloat16), w3.astype(jnp.bfloat16))

    # [B, C_OUT, N] -> [B, N, C_OUT]; fuses with the surrounding jit program.
    return jnp.swapaxes(out_t, 1, 2)


_forward_batched = jax.jit(_forward_batched_impl)


def local_fusion_forward(p, f, group_idx, w1, w2, w3):
    """Module-compatible API: single cloud [N,...] or batched [B,N,...]."""
    if p.ndim == 2:
        return _forward_batched(p[None], f[None], group_idx[None], w1, w2, w3)[0]
    return _forward_batched(p, f, group_idx, w1, w2, w3)


# ----------------------------- pure-JAX reference ----------------------------
def _reference(p, f, group_idx, w1, w2, w3):
    def bn(x, gamma=1.0):
        mean = jnp.mean(x, axis=0, keepdims=True)
        var = jnp.mean(jnp.square(x - mean), axis=0, keepdims=True)
        return gamma * (x - mean) * jax.lax.rsqrt(var + BN_EPS)

    def gelu(x):                                    # exact erf GELU (nn.GELU default)
        return 0.5 * x * (1.0 + jax.lax.erf(x * _INV_SQRT2))

    p_group = p[group_idx] - p[:, None, :]                      # [N, K, 3]
    f_group = f[group_idx]                                      # [N, K, C_IN]
    x = jnp.concatenate([p_group, f_group], axis=-1).reshape(-1, EMB_IN)
    h = gelu(bn(x @ w1.T))
    h = gelu(bn(h @ w2.T))
    h = (h @ w3.T).reshape(N, K, C_OUT)
    g = jnp.max(h, axis=1)
    return bn(g, HEAD_BN_GAMMA)


# ----------------------------- main ------------------------------------------
if __name__ == "__main__":
    key = jax.random.PRNGKey(0)
    kp, kf, kg, k1, k2, k3 = jax.random.split(key, 6)

    p = jax.random.normal(kp, (N, 3), dtype=jnp.float32)
    f = jax.random.normal(kf, (N, C_IN), dtype=jnp.float32)
    group_idx = jax.random.randint(kg, (N, K), 0, N, dtype=jnp.int32)

    # bias-free Linear weights in native PyTorch layout [out, in]
    w1 = jax.random.normal(k1, (H1, EMB_IN), jnp.float32) * (1.0 / math.sqrt(EMB_IN))
    w2 = jax.random.normal(k2, (H2, H1), jnp.float32) * (1.0 / math.sqrt(H1))
    w3 = jax.random.normal(k3, (C_OUT, H2), jnp.float32) * (1.0 / math.sqrt(H2))

    # single-cloud path (module-equivalent)
    out = jax.block_until_ready(local_fusion_forward(p, f, group_idx, w1, w2, w3))
    ref = jax.block_until_ready(_reference(p, f, group_idx, w1, w2, w3))
    assert out.shape == (N, C_OUT)
    # bf16 MXU operands with f32 accumulation: numeric contract is 5e-2.
    np.testing.assert_allclose(np.asarray(out), np.asarray(ref), rtol=5e-2, atol=5e-2)

    # batched path: grid=(B,) with "parallel" semantics (both v7x TensorCores)
    B = 4
    kbp, kbf, kbg = jax.random.split(jax.random.PRNGKey(1), 3)
    pb = jax.random.normal(kbp, (B, N, 3), dtype=jnp.float32)
    fb = jax.random.normal(kbf, (B, N, C_IN), dtype=jnp.float32)
    gb = jax.random.randint(kbg, (B, N, K), 0, N, dtype=jnp.int32)
    outb = jax.block_until_ready(local_fusion_forward(pb, fb, gb, w1, w2, w3))
    refb = jnp.stack([_reference(pb[i], fb[i], gb[i], w1, w2, w3) for i in range(B)])
    refb = jax.block_until_ready(refb)
    assert outb.shape == (B, N, C_OUT)
    np.testing.assert_allclose(np.asarray(outb), np.asarray(refb), rtol=5e-2, atol=5e-2)

    print("KERNEL_OK")
</pallas_src>

<mosaic_0001>
module attributes {stable_mosaic.version = 11 : i64} {
  func.func @_local_fusion_kernel(%arg0: i32, %arg1: memref<1x7x128xbf16, #tpu.memory_space<vmem>>, %arg2: memref<1x1x512xi32, #tpu.memory_space<vmem>>, %arg3: memref<16x7xbf16, #tpu.memory_space<vmem>>, %arg4: memref<32x16xbf16, #tpu.memory_space<vmem>>, %arg5: memref<64x32xbf16, #tpu.memory_space<vmem>>, %arg6: memref<1x64x64xf32, #tpu.memory_space<vmem>>, %arg7: memref<128x512xbf16, #tpu.memory_space<vmem>>) attributes {dimension_semantics = [#tpu.dimension_semantics<parallel>], iteration_bounds = array<i64: 1>, scalar_prefetch = 0 : i64, scratch_operands = 1 : i64, tpu.core_type = #tpu.core_type<tc>, window_params = [{transform_indices = @transform_0, window_bounds = array<i64: 1, 7, 128>}, {transform_indices = @transform_1, window_bounds = array<i64: 1, 1, 512>}, {pipeline_mode = #tpu.pipeline_mode<synchronous>, transform_indices = @transform_2, window_bounds = array<i64: 16, 7>}, {pipeline_mode = #tpu.pipeline_mode<synchronous>, transform_indices = @transform_3, window_bounds = array<i64: 32, 16>}, {pipeline_mode = #tpu.pipeline_mode<synchronous>, transform_indices = @transform_4, window_bounds = array<i64: 64, 32>}, {transform_indices = @transform_5, window_bounds = array<i64: 1, 64, 64>}]} {
    %0 = tpu.iota {dimensions = array<i32: 1>} : vector<1x128xi32>
    %c64_i32 = arith.constant 64 : i32
    %c0_i32 = arith.constant 0 : i32
    %1 = arith.cmpi eq, %c64_i32, %c0_i32 : i32
    %c1_i32 = arith.constant 1 : i32
    %2 = arith.select %1, %c1_i32, %c64_i32 : i32
    %3 = vector.broadcast %2 : i32 to vector<1x128xi32>
    %4 = arith.remsi %0, %3 : vector<1x128xi32>
    %c0_i32_0 = arith.constant 0 : i32
    %5 = vector.broadcast %c0_i32_0 : i32 to vector<1x128xi32>
    %6 = arith.cmpi ne, %4, %5 : vector<1x128xi32>
    %c0_i32_1 = arith.constant 0 : i32
    %7 = vector.broadcast %c0_i32_1 : i32 to vector<1x128xi32>
    %8 = arith.cmpi slt, %4, %7 : vector<1x128xi32>
    %c0_i32_2 = arith.constant 0 : i32
    %9 = arith.cmpi slt, %2, %c0_i32_2 : i32
    %10 = vector.broadcast %9 : i1 to vector<1x128xi1>
    %11 = vector.broadcast %10 : vector<1x128xi1> to vector<1x128xi1>
    %12 = arith.xori %8, %11 : vector<1x128xi1>
    %13 = arith.andi %12, %6 : vector<1x128xi1>
    %14 = vector.broadcast %2 : i32 to vector<1x128xi32>
    %15 = arith.addi %4, %14 : vector<1x128xi32>
    %16 = arith.select %13, %15, %4 : vector<1x128xi1>, vector<1x128xi32>
    %c64_i32_3 = arith.constant 64 : i32
    %17 = vector.broadcast %c64_i32_3 : i32 to vector<1x128xi32>
    %18 = arith.addi %16, %17 : vector<1x128xi32>
    %c0_i32_4 = arith.constant 0 : i32
    %c4_i32 = arith.constant 4 : i32
    %19 = arith.addi %c0_i32_4, %c4_i32 : i32
    %c1_i32_5 = arith.constant 1 : i32
    scf.for %arg8 = %c0_i32_4 to %19 step %c1_i32_5  : i32 {
      %c128_i32 = arith.constant 128 : i32
      %179 = arith.muli %arg8, %c128_i32 : i32
      %180 = tpu.assume_multiple %179, 128 : i32
      %c0_71 = arith.constant 0 : index
      %c0_72 = arith.constant 0 : index
      %181 = arith.index_cast %180 : i32 to index
      %182 = vector.load %arg2[%c0_71, %c0_72, %181] : memref<1x1x512xi32, #tpu.memory_space<vmem>>, vector<1x1x128xi32>
      %183 = vector.shape_cast %182 : vector<1x1x128xi32> to vector<1x128xi32>
      %184 = tpu.iota {dimensions = array<i32: 0>} : vector<128x128xi32>
      %185 = vector.broadcast %183 : vector<1x128xi32> to vector<128x128xi32>
      %186 = arith.cmpi eq, %184, %185 : vector<128x128xi32>
      %187 = vector.broadcast %18 : vector<1x128xi32> to vector<128x128xi32>
      %188 = arith.cmpi eq, %184, %187 : vector<128x128xi32>
      %cst_73 = arith.constant -1.000000e+00 : f32
      %cst_74 = arith.constant 0.000000e+00 : f32
      %189 = vector.broadcast %cst_73 : f32 to vector<128x128xf32>
      %190 = vector.broadcast %cst_74 : f32 to vector<128x128xf32>
      %191 = arith.select %188, %189, %190 : vector<128x128xi1>, vector<128x128xf32>
      %cst_75 = arith.constant 1.000000e+00 : f32
      %192 = vector.broadcast %cst_75 : f32 to vector<128x128xf32>
      %193 = arith.select %186, %192, %191 : vector<128x128xi1>, vector<128x128xf32>
      %194 = arith.truncf %193 : vector<128x128xf32> to vector<128x128xbf16>
      %c0_76 = arith.constant 0 : index
      %195 = arith.index_cast %180 : i32 to index
      %196 = vector.load %arg7[%c0_76, %195] : memref<128x512xbf16, #tpu.memory_space<vmem>>, vector<128x128xbf16>
      tpu.vector_store %arg7[%c0_76, %195], %194 {strides = array<i32>} : memref<128x512xbf16, #tpu.memory_space<vmem>>, vector<128x128xbf16>,
    }
    %c4_i32_6 = arith.constant 4 : i32
    %c0 = arith.constant 0 : index
    %c0_7 = arith.constant 0 : index
    %c0_8 = arith.constant 0 : index
    %20 = vector.load %arg1[%c0, %c0_7, %c0_8] : memref<1x7x128xbf16, #tpu.memory_space<vmem>>, vector<1x7x128xbf16>
    %21 = vector.shape_cast %20 : vector<1x7x128xbf16> to vector<7x128xbf16>
    %c0_9 = arith.constant 0 : index
    %c0_10 = arith.constant 0 : index
    %22 = vector.load %arg7[%c0_9, %c0_10] : memref<128x512xbf16, #tpu.memory_space<vmem>>, vector<128x512xbf16>
    %cst = arith.constant dense<0.000000e+00> : vector<7x512xf32>
    %23 = tpu.matmul %21, %22, %cst {dimension_numbers = #tpu.dot_dimension_numbers<[1], [0], [0], [1], [0, 0, 1, 1], [], []>} : vector<7x128xbf16>, vector<128x512xbf16>, vector<7x512xf32> -> vector<7x512xf32>
    %c0_11 = arith.constant 0 : index
    %c0_12 = arith.constant 0 : index
    %24 = vector.load %arg3[%c0_11, %c0_12] : memref<16x7xbf16, #tpu.memory_space<vmem>>, vector<16x7xbf16>
    %25 = arith.truncf %23 : vector<7x512xf32> to vector<7x512xbf16>
    %cst_13 = arith.constant dense<0.000000e+00> : vector<16x512xf32>
    %26 = tpu.matmul %24, %25, %cst_13 {dimension_numbers = #tpu.dot_dimension_numbers<[1], [0], [0], [1], [0, 0, 1, 1], [], []>} : vector<16x7xbf16>, vector<7x512xbf16>, vector<16x512xf32> -> vector<16x512xf32>
    %cst_14 = arith.constant dense<0.000000e+00> : vector<16xf32>
    %27 = vector.multi_reduction <add>, %26, %cst_14 [1] : vector<16x512xf32> to vector<16xf32>
    %28 = vector.shape_cast %27 : vector<16xf32> to vector<16x1xf32>
    %cst_15 = arith.constant 5.120000e+02 : f32
    %29 = vector.broadcast %cst_15 : f32 to vector<16x1xf32>
    %30 = arith.divf %28, %29 : vector<16x1xf32>
    %31 = vector.broadcast %30 : vector<16x1xf32> to vector<16x512xf32>
    %32 = arith.subf %26, %31 : vector<16x512xf32>
    %33 = arith.mulf %32, %32 : vector<16x512xf32>
    %cst_16 = arith.constant dense<0.000000e+00> : vector<16xf32>
    %34 = vector.multi_reduction <add>, %33, %cst_16 [1] : vector<16x512xf32> to vector<16xf32>
    %35 = vector.shape_cast %34 : vector<16xf32> to vector<16x1xf32>
    %cst_17 = arith.constant 5.120000e+02 : f32
    %36 = vector.broadcast %cst_17 : f32 to vector<16x1xf32>
    %37 = arith.divf %35, %36 : vector<16x1xf32>
    %cst_18 = arith.constant 1.000000e+00 : f32
    %38 = vector.broadcast %cst_18 : f32 to vector<16x512xf32>
    %39 = arith.mulf %38, %32 : vector<16x512xf32>
    %cst_19 = arith.constant 9.99999974E-6 : f32
    %40 = vector.broadcast %cst_19 : f32 to vector<16x1xf32>
    %41 = arith.addf %37, %40 : vector<16x1xf32>
    %42 = math.rsqrt %41 : vector<16x1xf32>
    %43 = vector.broadcast %42 : vector<16x1xf32> to vector<16x512xf32>
    %44 = arith.mulf %39, %43 : vector<16x512xf32>
    %cst_20 = arith.constant 5.000000e-01 : f32
    %45 = vector.broadcast %cst_20 : f32 to vector<16x512xf32>
    %46 = arith.mulf %45, %44 : vector<16x512xf32>
    %cst_21 = arith.constant 0.707106769 : f32
    %47 = vector.broadcast %cst_21 : f32 to vector<16x512xf32>
    %48 = arith.mulf %44, %47 : vector<16x512xf32>
    %cst_22 = arith.constant 0.000000e+00 : f32
    %49 = vector.broadcast %cst_22 : f32 to vector<16x512xf32>
    %50 = arith.cmpf oge, %48, %49 : vector<16x512xf32>
    %cst_23 = arith.constant 1.000000e+00 : f32
    %cst_24 = arith.constant -1.000000e+00 : f32
    %51 = vector.broadcast %cst_23 : f32 to vector<16x512xf32>
    %52 = vector.broadcast %cst_24 : f32 to vector<16x512xf32>
    %53 = arith.select %50, %51, %52 : vector<16x512xi1>, vector<16x512xf32>
    %54 = math.absf %48 : vector<16x512xf32>
    %cst_25 = arith.constant 0.327591091 : f32
    %55 = vector.broadcast %cst_25 : f32 to vector<16x512xf32>
    %56 = arith.mulf %55, %54 : vector<16x512xf32>
    %cst_26 = arith.constant 1.000000e+00 : f32
    %57 = vector.broadcast %cst_26 : f32 to vector<16x512xf32>
    %58 = arith.addf %57, %56 : vector<16x512xf32>
    %59 = tpu.reciprocal %58 {approx = true} : vector<16x512xf32> -> vector<16x512xf32>
    %cst_27 = arith.constant 1.06140542 : f32
    %60 = vector.broadcast %cst_27 : f32 to vector<16x512xf32>
    %61 = arith.mulf %60, %59 : vector<16x512xf32>
    %cst_28 = arith.constant -1.45315206 : f32
    %62 = vector.broadcast %cst_28 : f32 to vector<16x512xf32>
    %63 = arith.addf %61, %62 : vector<16x512xf32>
    %64 = arith.mulf %63, %59 : vector<16x512xf32>
    %cst_29 = arith.constant 1.42141378 : f32
    %65 = vector.broadcast %cst_29 : f32 to vector<16x512xf32>
    %66 = arith.addf %64, %65 : vector<16x512xf32>
    %67 = arith.mulf %66, %59 : vector<16x512xf32>
    %cst_30 = arith.constant -0.284496725 : f32
    %68 = vector.broadcast %cst_30 : f32 to vector<16x512xf32>
    %69 = arith.addf %67, %68 : vector<16x512xf32>
    %70 = arith.mulf %69, %59 : vector<16x512xf32>
    %cst_31 = arith.constant 0.254829586 : f32
    %71 = vector.broadcast %cst_31 : f32 to vector<16x512xf32>
    %72 = arith.addf %70, %71 : vector<16x512xf32>
    %73 = arith.mulf %72, %59 : vector<16x512xf32>
    %cst_32 = arith.constant 0.000000e+00 : f32
    %74 = vector.broadcast %cst_32 : f32 to vector<16x512xf32>
    %75 = arith.subf %74, %54 : vector<16x512xf32>
    %76 = arith.mulf %75, %54 : vector<16x512xf32>
    %77 = math.exp %76 : vector<16x512xf32>
    %78 = arith.mulf %73, %77 : vector<16x512xf32>
    %cst_33 = arith.constant 1.000000e+00 : f32
    %79 = vector.broadcast %cst_33 : f32 to vector<16x512xf32>
    %80 = arith.subf %79, %78 : vector<16x512xf32>
    %81 = arith.mulf %53, %80 : vector<16x512xf32>
    %cst_34 = arith.constant 1.000000e+00 : f32
    %82 = vector.broadcast %cst_34 : f32 to vector<16x512xf32>
    %83 = arith.addf %82, %81 : vector<16x512xf32>
    %84 = arith.mulf %46, %83 : vector<16x512xf32>
    %c0_35 = arith.constant 0 : index
    %c0_36 = arith.constant 0 : index
    %85 = vector.load %arg4[%c0_35, %c0_36] : memref<32x16xbf16, #tpu.memory_space<vmem>>, vector<32x16xbf16>
    %86 = arith.truncf %84 : vector<16x512xf32> to vector<16x512xbf16>
    %cst_37 = arith.constant dense<0.000000e+00> : vector<32x512xf32>
    %87 = tpu.matmul %85, %86, %cst_37 {dimension_numbers = #tpu.dot_dimension_numbers<[1], [0], [0], [1], [0, 0, 1, 1], [], []>} : vector<32x16xbf16>, vector<16x512xbf16>, vector<32x512xf32> -> vector<32x512xf32>
    %cst_38 = arith.constant dense<0.000000e+00> : vector<32xf32>
    %88 = vector.multi_reduction <add>, %87, %cst_38 [1] : vector<32x512xf32> to vector<32xf32>
    %89 = vector.shape_cast %88 : vector<32xf32> to vector<32x1xf32>
    %cst_39 = arith.constant 5.120000e+02 : f32
    %90 = vector.broadcast %cst_39 : f32 to vector<32x1xf32>
    %91 = arith.divf %89, %90 : vector<32x1xf32>
    %92 = vector.broadcast %91 : vector<32x1xf32> to vector<32x512xf32>
    %93 = arith.subf %87, %92 : vector<32x512xf32>
    %94 = arith.mulf %93, %93 : vector<32x512xf32>
    %cst_40 = arith.constant dense<0.000000e+00> : vector<32xf32>
    %95 = vector.multi_reduction <add>, %94, %cst_40 [1] : vector<32x512xf32> to vector<32xf32>
    %96 = vector.shape_cast %95 : vector<32xf32> to vector<32x1xf32>
    %cst_41 = arith.constant 5.120000e+02 : f32
    %97 = vector.broadcast %cst_41 : f32 to vector<32x1xf32>
    %98 = arith.divf %96, %97 : vector<32x1xf32>
    %cst_42 = arith.constant 1.000000e+00 : f32
    %99 = vector.broadcast %cst_42 : f32 to vector<32x512xf32>
    %100 = arith.mulf %99, %93 : vector<32x512xf32>
    %cst_43 = arith.constant 9.99999974E-6 : f32
    %101 = vector.broadcast %cst_43 : f32 to vector<32x1xf32>
    %102 = arith.addf %98, %101 : vector<32x1xf32>
    %103 = math.rsqrt %102 : vector<32x1xf32>
    %104 = vector.broadcast %103 : vector<32x1xf32> to vector<32x512xf32>
    %105 = arith.mulf %100, %104 : vector<32x512xf32>
    %cst_44 = arith.constant 5.000000e-01 : f32
    %106 = vector.broadcast %cst_44 : f32 to vector<32x512xf32>
    %107 = arith.mulf %106, %105 : vector<32x512xf32>
    %cst_45 = arith.constant 0.707106769 : f32
    %108 = vector.broadcast %cst_45 : f32 to vector<32x512xf32>
    %109 = arith.mulf %105, %108 : vector<32x512xf32>
    %cst_46 = arith.constant 0.000000e+00 : f32
    %110 = vector.broadcast %cst_46 : f32 to vector<32x512xf32>
    %111 = arith.cmpf oge, %109, %110 : vector<32x512xf32>
    %cst_47 = arith.constant 1.000000e+00 : f32
    %cst_48 = arith.constant -1.000000e+00 : f32
    %112 = vector.broadcast %cst_47 : f32 to vector<32x512xf32>
    %113 = vector.broadcast %cst_48 : f32 to vector<32x512xf32>
    %114 = arith.select %111, %112, %113 : vector<32x512xi1>, vector<32x512xf32>
    %115 = math.absf %109 : vector<32x512xf32>
    %cst_49 = arith.constant 0.327591091 : f32
    %116 = vector.broadcast %cst_49 : f32 to vector<32x512xf32>
    %117 = arith.mulf %116, %115 : vector<32x512xf32>
    %cst_50 = arith.constant 1.000000e+00 : f32
    %118 = vector.broadcast %cst_50 : f32 to vector<32x512xf32>
    %119 = arith.addf %118, %117 : vector<32x512xf32>
    %120 = tpu.reciprocal %119 {approx = true} : vector<32x512xf32> -> vector<32x512xf32>
    %cst_51 = arith.constant 1.06140542 : f32
    %121 = vector.broadcast %cst_51 : f32 to vector<32x512xf32>
    %122 = arith.mulf %121, %120 : vector<32x512xf32>
    %cst_52 = arith.constant -1.45315206 : f32
    %123 = vector.broadcast %cst_52 : f32 to vector<32x512xf32>
    %124 = arith.addf %122, %123 : vector<32x512xf32>
    %125 = arith.mulf %124, %120 : vector<32x512xf32>
    %cst_53 = arith.constant 1.42141378 : f32
    %126 = vector.broadcast %cst_53 : f32 to vector<32x512xf32>
    %127 = arith.addf %125, %126 : vector<32x512xf32>
    %128 = arith.mulf %127, %120 : vector<32x512xf32>
    %cst_54 = arith.constant -0.284496725 : f32
    %129 = vector.broadcast %cst_54 : f32 to vector<32x512xf32>
    %130 = arith.addf %128, %129 : vector<32x512xf32>
    %131 = arith.mulf %130, %120 : vector<32x512xf32>
    %cst_55 = arith.constant 0.254829586 : f32
    %132 = vector.broadcast %cst_55 : f32 to vector<32x512xf32>
    %133 = arith.addf %131, %132 : vector<32x512xf32>
    %134 = arith.mulf %133, %120 : vector<32x512xf32>
    %cst_56 = arith.constant 0.000000e+00 : f32
    %135 = vector.broadcast %cst_56 : f32 to vector<32x512xf32>
    %136 = arith.subf %135, %115 : vector<32x512xf32>
    %137 = arith.mulf %136, %115 : vector<32x512xf32>
    %138 = math.exp %137 : vector<32x512xf32>
    %139 = arith.mulf %134, %138 : vector<32x512xf32>
    %cst_57 = arith.constant 1.000000e+00 : f32
    %140 = vector.broadcast %cst_57 : f32 to vector<32x512xf32>
    %141 = arith.subf %140, %139 : vector<32x512xf32>
    %142 = arith.mulf %114, %141 : vector<32x512xf32>
    %cst_58 = arith.constant 1.000000e+00 : f32
    %143 = vector.broadcast %cst_58 : f32 to vector<32x512xf32>
    %144 = arith.addf %143, %142 : vector<32x512xf32>
    %145 = arith.mulf %107, %144 : vector<32x512xf32>
    %c0_59 = arith.constant 0 : index
    %c0_60 = arith.constant 0 : index
    %146 = vector.load %arg5[%c0_59, %c0_60] : memref<64x32xbf16, #tpu.memory_space<vmem>>, vector<64x32xbf16>
    %147 = arith.truncf %145 : vector<32x512xf32> to vector<32x512xbf16>
    %cst_61 = arith.constant dense<0.000000e+00> : vector<64x512xf32>
    %148 = tpu.matmul %146, %147, %cst_61 {dimension_numbers = #tpu.dot_dimension_numbers<[1], [0], [0], [1], [0, 0, 1, 1], [], []>} : vector<64x32xbf16>, vector<32x512xbf16>, vector<64x512xf32> -> vector<64x512xf32>
    %149 = vector.extract_strided_slice %148 {offsets = [0, 0], sizes = [64, 256], strides = [1, 1]} : vector<64x512xf32> to vector<64x256xf32>
    %150 = vector.extract_strided_slice %148 {offsets = [0, 256], sizes = [64, 256], strides = [1, 1]} : vector<64x512xf32> to vector<64x256xf32>
    %151 = arith.maximumf %149, %150 : vector<64x256xf32>
    %152 = vector.extract_strided_slice %151 {offsets = [0, 0], sizes = [64, 128], strides = [1, 1]} : vector<64x256xf32> to vector<64x128xf32>
    %153 = vector.extract_strided_slice %151 {offsets = [0, 128], sizes = [64, 128], strides = [1, 1]} : vector<64x256xf32> to vector<64x128xf32>
    %154 = arith.maximumf %152, %153 : vector<64x128xf32>
    %155 = vector.extract_strided_slice %154 {offsets = [0, 0], sizes = [64, 64], strides = [1, 1]} : vector<64x128xf32> to vector<64x64xf32>
    %156 = vector.extract_strided_slice %154 {offsets = [0, 64], sizes = [64, 64], strides = [1, 1]} : vector<64x128xf32> to vector<64x64xf32>
    %157 = arith.maximumf %155, %156 : vector<64x64xf32>
    %cst_62 = arith.constant dense<0.000000e+00> : vector<64xf32>
    %158 = vector.multi_reduction <add>, %157, %cst_62 [1] : vector<64x64xf32> to vector<64xf32>
    %159 = vector.shape_cast %158 : vector<64xf32> to vector<64x1xf32>
    %cst_63 = arith.constant 6.400000e+01 : f32
    %160 = vector.broadcast %cst_63 : f32 to vector<64x1xf32>
    %161 = arith.divf %159, %160 : vector<64x1xf32>
    %162 = vector.broadcast %161 : vector<64x1xf32> to vector<64x64xf32>
    %163 = arith.subf %157, %162 : vector<64x64xf32>
    %164 = arith.mulf %163, %163 : vector<64x64xf32>
    %cst_64 = arith.constant dense<0.000000e+00> : vector<64xf32>
    %165 = vector.multi_reduction <add>, %164, %cst_64 [1] : vector<64x64xf32> to vector<64xf32>
    %166 = vector.shape_cast %165 : vector<64xf32> to vector<64x1xf32>
    %cst_65 = arith.constant 6.400000e+01 : f32
    %167 = vector.broadcast %cst_65 : f32 to vector<64x1xf32>
    %168 = arith.divf %166, %167 : vector<64x1xf32>
    %cst_66 = arith.constant 8.000000e-01 : f32
    %169 = vector.broadcast %cst_66 : f32 to vector<64x64xf32>
    %170 = arith.mulf %169, %163 : vector<64x64xf32>
    %cst_67 = arith.constant 9.99999974E-6 : f32
    %171 = vector.broadcast %cst_67 : f32 to vector<64x1xf32>
    %172 = arith.addf %168, %171 : vector<64x1xf32>
    %173 = math.rsqrt %172 : vector<64x1xf32>
    %174 = vector.broadcast %173 : vector<64x1xf32> to vector<64x64xf32>
    %175 = arith.mulf %170, %174 : vector<64x64xf32>
    %c0_68 = arith.constant 0 : index
    %c0_69 = arith.constant 0 : index
    %c0_70 = arith.constant 0 : index
    %176 = vector.load %arg6[%c0_68, %c0_69, %c0_70] : memref<1x64x64xf32, #tpu.memory_space<vmem>>, vector<1x64x64xf32>
    %177 = vector.shape_cast %176 : vector<1x64x64xf32> to vector<64x64xf32>
    %178 = vector.shape_cast %175 : vector<64x64xf32> to vector<1x64x64xf32>
    tpu.vector_store %arg6[%c0_68, %c0_69, %c0_70], %178 {strides = array<i32>} : memref<1x64x64xf32, #tpu.memory_space<vmem>>, vector<1x64x64xf32>,
    return
  }
  func.func @transform_0(%arg0: i32) -> (i32, i32, i32) {
    %c0_i32 = arith.constant 0 : i32
    %c0_i32_0 = arith.constant 0 : i32
    %c0_i32_1 = arith.constant 0 : i32
    return %arg0, %c0_i32, %c0_i32_0 : i32, i32, i32
  }
  func.func @transform_1(%arg0: i32) -> (i32, i32, i32) {
    %c0_i32 = arith.constant 0 : i32
    %c0_i32_0 = arith.constant 0 : i32
    %c0_i32_1 = arith.constant 0 : i32
    return %arg0, %c0_i32, %c0_i32_0 : i32, i32, i32
  }
  func.func @transform_2(%arg0: i32) -> (i32, i32) {
    %c0_i32 = arith.constant 0 : i32
    %c0_i32_0 = arith.constant 0 : i32
    %c0_i32_1 = arith.constant 0 : i32
    return %c0_i32, %c0_i32_0 : i32, i32
  }
  func.func @transform_3(%arg0: i32) -> (i32, i32) {
    %c0_i32 = arith.constant 0 : i32
    %c0_i32_0 = arith.constant 0 : i32
    %c0_i32_1 = arith.constant 0 : i32
    return %c0_i32, %c0_i32_0 : i32, i32
  }
  func.func @transform_4(%arg0: i32) -> (i32, i32) {
    %c0_i32 = arith.constant 0 : i32
    %c0_i32_0 = arith.constant 0 : i32
    %c0_i32_1 = arith.constant 0 : i32
    return %c0_i32, %c0_i32_0 : i32, i32
  }
  func.func @transform_5(%arg0: i32) -> (i32, i32, i32) {
    %c0_i32 = arith.constant 0 : i32
    %c0_i32_0 = arith.constant 0 : i32
    %c0_i32_1 = arith.constant 0 : i32
    return %arg0, %c0_i32, %c0_i32_0 : i32, i32, i32
  }
}

</mosaic_0001>

<bundles_post_ra>
// kernel: _forward_batched_impl.1
= control target key start
LH: loop header
LB: loop body
LE: loop exit
PB: predicated region body
PF: predicated region fallthrough
CT: control target
= control target key end

     0   :  { %v21_v0 = vlaneseq  ;;  %s1901_s18 = smov 0   ;;  %s2619_s0 = inlined_call_operand.vmem [shape: bf16[1,7,128], index: 0, kind: input, shape index: {}]   ;;  %s2620_s1 = inlined_call_operand.vmem [shape: s32[1,1,512], index: 1, kind: input, shape index: {}]   ;;  %s2621_s2 = inlined_call_operand.vmem [shape: bf16[16,7], index: 2, kind: input, shape index: {}]   ;;  %s2622_s3 = inlined_call_operand.vmem [shape: bf16[32,16], index: 3, kind: input, shape index: {}]   ;;  %s2623_s4 = inlined_call_operand.vmem [shape: bf16[64,32], index: 4, kind: input, shape index: {}]   ;;  %s2624_s5 = inlined_call_operand.vmem [shape: f32[1,64,64], index: 5, kind: output, shape index: {}]  }
   0x2   :  { %v22_v1 = vand.u32 127, %v21_v0 }
   0x4   :  { %v27_v2 = vand.u32 63, %v22_v1 }
   0x6   :  { %v1899_v3 = vadd.s32 64, %v27_v2 }
   0x7 LB: > { %v48_v4 = vshrl.u32 %v21_v0, 7  ;;  %s1687_s19 = sshll.u32 %s1861_s18, 7  ;;  %v1863_v21 = vmov 0.0   ;;  %s41_s18 = sadd.s32 1, %s1861_s18   ;;  %s1861_s18 = sphi %s1901_s18, %s41_s18  }
   0x8   : > { %s1908_s20 = sshra.s32 %s1687_s19, 7  ;;  %p38_p0 = scmp.ge.s32.totalorder %s41_s18, 4  }
   0x9   : > { %v49_v5 = vadd.s32 8, %v48_v4  ;;  %v50_v6 = vadd.s32 16, %v48_v4  ;;  %v51_v7 = vadd.s32 24, %v48_v4  ;;  %v52_v8 = vadd.s32 32, %v48_v4  ;;  %s45_s23 = scalar_lea.vmem %s2620_s1, %s1908_s20  ;;  %s1689_s24 = sshll.u32 %s1908_s20, 3 }
   0xa   : > { %v53_v9 = vadd.s32 40, %v48_v4  ;;  %v54_v10 = vadd.s32 48, %v48_v4  ;;  %v55_v11 = vadd.s32 56, %v48_v4  ;;  %v56_v12 = vadd.s32 64, %v48_v4  ;;  %v1915_v17 = vld [vmem:[%s45_s23] ss:$0 sm:$0xff] }
   0xb   : > { %v57_v13 = vadd.s32 72, %v48_v4  ;;  %v58_v14 = vadd.s32 80, %v48_v4  ;;  %v59_v15 = vadd.s32 88, %v48_v4  ;;  %v60_v16 = vadd.s32 96, %v48_v4  ;;  %s1930_s25 = scalar_lea.vmem [#allocation2], %s1689_s24 }
   0xc   : > { %vm92_vm0 = vcmp.eq.s32.totalorder %v56_v12, %v1899_v3  ;;  %v61_v18 = vadd.s32 104, %v48_v4  ;;  %v1918_v19 = vadd.s32 112, %v48_v4  ;;  %v1920_v20 = vadd.s32 120, %v48_v4 }
   0xd   : > { %vm68_vm1 = vcmp.eq.s32.totalorder %v48_v4, %v1915_v17  ;;  %vm69_vm2 = vcmp.eq.s32.totalorder %v49_v5, %v1915_v17  ;;  %vm70_vm3 = vcmp.eq.s32.totalorder %v50_v6, %v1915_v17  ;;  %vm71_vm4 = vcmp.eq.s32.totalorder %v51_v7, %v1915_v17 }
   0xe   : > { %v116_v22 = vsel %vm68_vm1, 1.0, %v1863_v21  ;;  %v117_v23 = vsel %vm69_vm2, 1.0, %v1863_v21  ;;  %v118_v24 = vsel %vm70_vm3, 1.0, %v1863_v21  ;;  %v119_v25 = vsel %vm71_vm4, 1.0, %v1863_v21 }
   0xf   : > { %v132_v26 = vpack.c.bf16 %v117_v23, %v116_v22  ;;  %v133_v27 = vpack.c.bf16 %v119_v25, %v118_v24  ;;  %vm72_vm5 = vcmp.eq.s32.totalorder %v52_v8, %v1915_v17  ;;  %vm73_vm6 = vcmp.eq.s32.totalorder %v53_v9, %v1915_v17  ;;  %v150_v23 = vld [vmem:[%s2619_s0] sm:$0xf] (%p38_p0) }
  0x10   : > { %v120_v28 = vsel %vm72_vm5, 1.0, %v1863_v21  ;;  %v121_v29 = vsel %vm73_vm6, 1.0, %v1863_v21  ;;  %vm74_vm7 = vcmp.eq.s32.totalorder %v54_v10, %v1915_v17  ;;  %vm75_vm8 = vcmp.eq.s32.totalorder %v55_v11, %v1915_v17 }
  0x11   : > { %142 = vst [vmem:[%s1930_s25] sm:$0xff] %v132_v26  ;;  %143 = vst [vmem:[%s1930_s25 + $0x20] sm:$0xff] %v133_v27  ;;  %v134_v30 = vpack.c.bf16 %v121_v29, %v120_v28  ;;  %v122_v31 = vsel %vm74_vm7, 1.0, %v1863_v21  ;;  %v123_v32 = vsel %vm75_vm8, 1.0, %v1863_v21  ;;  %vm76_vm9 = vcmp.eq.s32.totalorder %v56_v12, %v1915_v17 }
  0x12   : > { %v135_v33 = vpack.c.bf16 %v123_v32, %v122_v31  ;;  %vm77_vm10 = vcmp.eq.s32.totalorder %v57_v13, %v1915_v17  ;;  %vm93_vm11 = vcmp.eq.s32.totalorder %v57_v13, %v1899_v3  ;;  %v108_v34 = vsel %vm92_vm0, -1.0, %v1863_v21 }
  0x13   : > { %144 = vst [vmem:[%s1930_s25 + $0x40] sm:$0xff] %v134_v30  ;;  %v109_v35 = vsel %vm93_vm11, -1.0, %v1863_v21  ;;  %v124_v36 = vsel %vm76_vm9, 1.0, %v108_v34  ;;  %vm78_vm12 = vcmp.eq.s32.totalorder %v58_v14, %v1915_v17  ;;  %vm79_vm13 = vcmp.eq.s32.totalorder %v59_v15, %v1915_v17 }
  0x14   : > { %145 = vst [vmem:[%s1930_s25 + $0x60] sm:$0xff] %v135_v33  ;;  %v125_v37 = vsel %vm77_vm10, 1.0, %v109_v35  ;;  %vm94_vm14 = vcmp.eq.s32.totalorder %v58_v14, %v1899_v3  ;;  %vm95_vm15 = vcmp.eq.s32.totalorder %v59_v15, %v1899_v3  ;;  %vm80_vm1 = vcmp.eq.s32.totalorder %v60_v16, %v1915_v17 }
  0x15   : > { %v136_v38 = vpack.c.bf16 %v125_v37, %v124_v36  ;;  %v110_v39 = vsel %vm94_vm14, -1.0, %v1863_v21  ;;  %v111_v40 = vsel %vm95_vm15, -1.0, %v1863_v21  ;;  %vm81_vm0 = vcmp.eq.s32.totalorder %v61_v18, %v1915_v17 }
  0x16   : > { %v126_v41 = vsel %vm78_vm12, 1.0, %v110_v39  ;;  %v127_v42 = vsel %vm79_vm13, 1.0, %v111_v40  ;;  %vm96_vm2 = vcmp.eq.s32.totalorder %v60_v16, %v1899_v3  ;;  %vm97_vm3 = vcmp.eq.s32.totalorder %v61_v18, %v1899_v3 }
  0x17   : > { %146 = vst [vmem:[%s1930_s25 + $0x80] sm:$0xff] %v136_v38  ;;  %v137_v43 = vpack.c.bf16 %v127_v42, %v126_v41  ;;  %v112_v44 = vsel %vm96_vm2, -1.0, %v1863_v21  ;;  %v113_v45 = vsel %vm97_vm3, -1.0, %v1863_v21  ;;  %vm82_vm4 = vcmp.eq.s32.totalorder %v1918_v19, %v1915_v17 }
  0x18   : > { %v128_v46 = vsel %vm80_vm1, 1.0, %v112_v44  ;;  %v129_v47 = vsel %vm81_vm0, 1.0, %v113_v45  ;;  %vm83_vm5 = vcmp.eq.s32.totalorder %v1920_v20, %v1915_v17  ;;  %vm98_vm6 = vcmp.eq.s32.totalorder %v1918_v19, %v1899_v3  ;;  %40 = sbr.rel (!%p38_p0) target bundleno = 7 (0x7), region = 49 }
  0x19   : > { %147 = vst [vmem:[%s1930_s25 + $0xa0] sm:$0xff] %v137_v43  ;;  %v138_v48 = vpack.c.bf16 %v129_v47, %v128_v46  ;;  %vm99_vm7 = vcmp.eq.s32.totalorder %v1920_v20, %v1899_v3  ;;  %v114_v49 = vsel %vm98_vm6, -1.0, %v1863_v21  ;;  %v1864_v1 = vmov (%p38_p0), 0   ;;  %v1724_v43 = vld [vmem:[%s2621_s2] sm:$0xff] (%p38_p0)  }
  0x1a   : > { %v115_v50 = vsel %vm99_vm7, -1.0, %v1863_v21  ;;  %v130_v51 = vsel %vm82_vm4, 1.0, %v114_v49  ;;  %215 = vmatprep.mubr.bf16.mxu0 (%p38_p0), %v1864_v1  ;;  %256 = vmatprep.mubr.bf16.mxu1 (%p38_p0), %v1864_v1  ;;  %vm280_vm8 = vcmask (%p38_p0), 1042432   ;;  %vm281_vm9 = vcmask (%p38_p0), 1043456  }
  0x1b   : > { %148 = vst [vmem:[%s1930_s25 + $0xc0] sm:$0xff] %v138_v48  ;;  %v131_v52 = vsel %vm83_vm5, 1.0, %v115_v50  ;;  %v1865_v24 = vmov (%p38_p0), 65535   ;;  %vm276_vm10 = vcmask (%p38_p0), 56320   ;;  %vm661_vm3 = vcmask (%p38_p0), 130048  }
  0x1c   : > { %v139_v53 = vpack.c.bf16 %v131_v52, %v130_v51  ;;  %v282_v25 = vsel (%p38_p0), %vm280_vm8, 4294967295, %v1865_v24 }
  0x1d   :  { %v283_v29 = vsel (%p38_p0), %vm281_vm9, %v282_v25, 0 }
  0x1e   : > { %149 = vst [vmem:[%s1930_s25 + $0xe0] sm:$0xff] %v139_v53 }
  0x25   :  { %v152_v54 = vld [vmem:[#allocation2 + $0x8] sm:$0xff]  ;;  %v154_v55 = vld [vmem:[#allocation2 + $0x18] sm:$0xff]  ;;  %v151_v56 = vld [vmem:[#allocation2] sm:$0xff] }
  0x26   :  { %183 = vmatprep.subr.bf16.mxu0 %v152_v54  ;;  %224 = vmatprep.subr.bf16.mxu1 %v154_v55  ;;  %v153_v57 = vld [vmem:[#allocation2 + $0x10] sm:$0xff]  ;;  %v156_v58 = vld [vmem:[#allocation2 + $0x28] sm:$0xff]  ;;  %v158_v59 = vld [vmem:[#allocation2 + $0x38] sm:$0xff] }
  0x27   :  { %184 = vmatpush1.bf16.msra.mxu0 %v151_v56  ;;  %225 = vmatpush1.bf16.msra.mxu1 %v153_v57  ;;  %v155_v60 = vld [vmem:[#allocation2 + $0x20] sm:$0xff]  ;;  %v157_v61 = vld [vmem:[#allocation2 + $0x30] sm:$0xff]  ;;  %v160_v62 = vld [vmem:[#allocation2 + $0x48] sm:$0xff] }
  0x28   :  { %185 = vmatprep.subr.bf16.mxu0 %v156_v58  ;;  %226 = vmatprep.subr.bf16.mxu1 %v158_v59  ;;  %v162_v63 = vld [vmem:[#allocation2 + $0x58] sm:$0xff]  ;;  %v159_v0 = vld [vmem:[#allocation2 + $0x40] sm:$0xff]  ;;  %v161_v2 = vld [vmem:[#allocation2 + $0x50] sm:$0xff] }
  0x29   :  { %v164_v3 = vld [vmem:[#allocation2 + $0x68] sm:$0xff]  ;;  %v166_v4 = vld [vmem:[#allocation2 + $0x78] sm:$0xff]  ;;  %v163_v5 = vld [vmem:[#allocation2 + $0x60] sm:$0xff] }
  0x2a   :  { %v165_v6 = vld [vmem:[#allocation2 + $0x70] sm:$0xff]  ;;  %v168_v7 = vld [vmem:[#allocation2 + $0x88] sm:$0xff]  ;;  %v170_v8 = vld [vmem:[#allocation2 + $0x98] sm:$0xff] }
  0x2b   :  { %186 = vmatpush1.bf16.msra.mxu0 %v155_v60  ;;  %227 = vmatpush1.bf16.msra.mxu1 %v157_v61  ;;  %v167_v9 = vld [vmem:[#allocation2 + $0x80] sm:$0xff]  ;;  %v169_v10 = vld [vmem:[#allocation2 + $0x90] sm:$0xff]  ;;  %v172_v11 = vld [vmem:[#allocation2 + $0xa8] sm:$0xff] }
  0x2c   :  { %187 = vmatprep.subr.bf16.mxu0 %v160_v62  ;;  %228 = vmatprep.subr.bf16.mxu1 %v162_v63  ;;  %v174_v12 = vld [vmem:[#allocation2 + $0xb8] sm:$0xff]  ;;  %v171_v13 = vld [vmem:[#allocation2 + $0xa0] sm:$0xff]  ;;  %v173_v14 = vld [vmem:[#allocation2 + $0xb0] sm:$0xff] }
  0x2d   :  { %v176_v15 = vld [vmem:[#allocation2 + $0xc8] sm:$0xff]  ;;  %v178_v16 = vld [vmem:[#allocation2 + $0xd8] sm:$0xff]  ;;  %v175_v17 = vld [vmem:[#allocation2 + $0xc0] sm:$0xff] }
  0x2e   :  { %v177_v18 = vld [vmem:[#allocation2 + $0xd0] sm:$0xff]  ;;  %v180_v19 = vld [vmem:[#allocation2 + $0xe8] sm:$0xff]  ;;  %v182_v20 = vld [vmem:[#allocation2 + $0xf8] sm:$0xff] }
  0x2f   :  { %188 = vmatpush1.bf16.msra.mxu0 %v159_v0  ;;  %229 = vmatpush1.bf16.msra.mxu1 %v161_v2  ;;  %v179_v21 = vld [vmem:[#allocation2 + $0xe0] sm:$0xff]  ;;  %v181_v22 = vld [vmem:[#allocation2 + $0xf0] sm:$0xff] }
  0x30   :  { %189 = vmatprep.subr.bf16.mxu0 %v164_v3  ;;  %230 = vmatprep.subr.bf16.mxu1 %v166_v4 }
  0x33   :  { %190 = vmatpush1.bf16.msra.mxu0 %v163_v5  ;;  %231 = vmatpush1.bf16.msra.mxu1 %v165_v6 }
  0x34   :  { %191 = vmatprep.subr.bf16.mxu0 %v168_v7  ;;  %232 = vmatprep.subr.bf16.mxu1 %v170_v8 }
  0x37   :  { %192 = vmatpush1.bf16.msra.mxu0 %v167_v9  ;;  %233 = vmatpush1.bf16.msra.mxu1 %v169_v10 }
  0x38   :  { %193 = vmatprep.subr.bf16.mxu0 %v172_v11  ;;  %234 = vmatprep.subr.bf16.mxu1 %v174_v12 }
  0x3b   :  { %194 = vmatpush1.bf16.msra.mxu0 %v171_v13  ;;  %235 = vmatpush1.bf16.msra.mxu1 %v173_v14 }
  0x3c   :  { %195 = vmatprep.subr.bf16.mxu0 %v176_v15  ;;  %236 = vmatprep.subr.bf16.mxu1 %v178_v16 }
  0x3f   :  { %196 = vmatpush1.bf16.msra.mxu0 %v175_v17  ;;  %237 = vmatpush1.bf16.msra.mxu1 %v177_v18 }
  0x40   :  { %197 = vmatprep.subr.bf16.mxu0 %v180_v19  ;;  %238 = vmatprep.subr.bf16.mxu1 %v182_v20 }
  0x43   :  { %198 = vmatpush1.bf16.msra.mxu0 %v179_v21  ;;  %239 = vmatpush1.bf16.msra.mxu1 %v181_v22 }
  0x46   :  { %216 = vmatmul.mubr.bf16.vlgmr.msra.gmra.mrb[0].mxu0 %v150_v23  ;;  %257 = vmatmul.mubr.bf16.vlgmr.msra.gmra.mrb[0].mxu1 %v150_v23 }
  0x47   :  { %328 = vmatprep.mubr.bf16.mxu0 %v1864_v1  ;;  %371 = vmatprep.mubr.bf16.mxu1 %v1864_v1 }
 0x119   :  { %v217_v26 = vpop.f32.mrb[0].mxu0  ;;  %v258_v27 = vpop.f32.mrb[0].mxu1 }
 0x11a   :  { %v267_v28 = vpack.c.bf16 %v217_v26, %v217_v26  ;;  %v269_v30 = vpack.c.bf16 %v258_v27, %v258_v27  ;;  %v219_v31 = vpop.f32.mrb[1].mxu0  ;;  %v260_v32 = vpop.f32.mrb[1].mxu1 }
 0x11b   :  { %v268_v33 = vpack.c.bf16 %v219_v31, %v219_v31  ;;  %v270_v34 = vpack.c.bf16 %v260_v32, %v260_v32  ;;  %v221_v35 = vpop.f32.mrb[2].mxu0  ;;  %v262_v36 = vpop.f32.mrb[2].mxu1 }
 0x11c   :  { %v291_v37 = vand.u32 %v283_v29, %v269_v30  ;;  %v222_v38 = vpop.f32.mrb[3].mxu0  ;;  %v263_v39 = vpop.f32.mrb[3].mxu1  ;;  %v285_v42 = vand.u32 %v283_v29, %v267_v28 }
 0x11d   :  { %v288_v40 = vand.u32 %v283_v29, %v268_v33  ;;  %v294_v41 = vand.u32 %v283_v29, %v270_v34 }
 0x11f   :  { %296 = vmatprep.subr.bf16.mxu0 %v288_v40  ;;  %339 = vmatprep.subr.bf16.mxu1 %v294_v41 }
 0x120   :  { %297 = vmatpush1.bf16.msra.mxu0 %v285_v42  ;;  %340 = vmatpush1.bf16.msra.mxu1 %v291_v37 }
 0x123   :  { %1691 = vmatmul.mubr.msk.bf16.vlgmr.msra.gmra.mrb[4].mxu0 %vm276_vm10, %v1724_v43  ;;  %1692 = vmatmul.mubr.msk.bf16.vlgmr.msra.gmra.mrb[4].mxu1 %vm276_vm10, %v1724_v43 }
 0x124   :  { %700 = vmatprep.mubr.bf16.mxu0 %v1864_v1  ;;  %753 = vmatprep.mubr.bf16.mxu1 %v1864_v1 }
 0x1f6   :  { %v330_v44 = vpop.f32.mrb[4].mxu0  ;;  %v373_v45 = vpop.f32.mrb[4].mxu1 }
 0x1f7   :  { %v332_v46 = vpop.f32.mrb[5].mxu0  ;;  %v375_v47 = vpop.f32.mrb[5].mxu1 }
 0x1f8   :  { %v382_v48 = vadd.f32 %v332_v46, %v330_v44  ;;  %v334_v49 = vpop.f32.mrb[6].mxu0  ;;  %v377_v50 = vpop.f32.mrb[6].mxu1 }
 0x1f9   :  { %v336_v51 = vpop.f32.mrb[7].mxu0  ;;  %v379_v52 = vpop.f32.mrb[7].mxu1 }
 0x1fa   :  { %v387_v53 = vadd.f32 %v336_v51, %v334_v49  ;;  %v383_v54 = vadd.f32 %v382_v48, %v373_v45 }
 0x1fc   :  { %v384_v55 = vadd.f32 %v383_v54, %v375_v47  ;;  %v388_v56 = vadd.f32 %v387_v53, %v377_v50 }
 0x1fe   :  { %385 = vadd.xlane.f32.xlu0 %v384_v55  ;;  %v389_v57 = vadd.f32 %v388_v56, %v379_v52 }
 0x202   :  { %390 = vadd.xlane.f32.xlu0 %v389_v57 }
 0x28b   :  { %v386_v58 = vpop.xlane.xlu0 %385 }
 0x28c   :  { %v393_v59 = vmul.f32 0.001953125, %v386_v58 }
 0x28e   :  { %v395_v60 = vsub.f32 %v330_v44, %v393_v59  ;;  %v396_v61 = vsub.f32 %v332_v46, %v393_v59  ;;  %v397_v62 = vsub.f32 %v373_v45, %v393_v59  ;;  %v398_v0 = vsub.f32 %v375_v47, %v393_v59 }
 0x28f   :  { %v391_v63 = vpop.xlane.xlu0 %390 }
 0x290   :  { %v394_v2 = vmul.f32 0.001953125, %v391_v63  ;;  %v403_v3 = vmul.f32 %v395_v60, %v395_v60  ;;  %v404_v4 = vmul.f32 %v396_v61, %v396_v61  ;;  %v405_v5 = vmul.f32 %v397_v62, %v397_v62 }
 0x291   :  { %v406_v10 = vmul.f32 %v398_v0, %v398_v0 }
 0x292   :  { %v399_v6 = vsub.f32 %v334_v49, %v394_v2  ;;  %v400_v7 = vsub.f32 %v336_v51, %v394_v2  ;;  %v411_v8 = vadd.f32 %v404_v4, %v403_v3  ;;  %v1976_v9 = vsub.f32 %v377_v50, %v394_v2 }
 0x293   :  { %v402_v12 = vsub.f32 %v379_v52, %v394_v2 }
 0x294   :  { %v412_v11 = vadd.f32 %v411_v8, %v405_v5  ;;  %v407_v13 = vmul.f32 %v399_v6, %v399_v6  ;;  %v408_v14 = vmul.f32 %v400_v7, %v400_v7  ;;  %v409_v16 = vmul.f32 %v1976_v9, %v1976_v9 }
 0x295   :  { %v410_v18 = vmul.f32 %v402_v12, %v402_v12 }
 0x296   :  { %v413_v15 = vadd.f32 %v412_v11, %v406_v10  ;;  %v416_v17 = vadd.f32 %v408_v14, %v407_v13 }
 0x298   :  { %414 = vadd.xlane.f32.xlu1 %v413_v15  ;;  %v417_v19 = vadd.f32 %v416_v17, %v409_v16 }
 0x29a   :  { %v418_v20 = vadd.f32 %v417_v19, %v410_v18 }
 0x29c   :  { %419 = vadd.xlane.f32.xlu1 %v418_v20 }
 0x325   :  { %v415_v21 = vpop.xlane.xlu1 %414 }
 0x326   :  { %v421_v22 = vmul.f32 0.001953125, %v415_v21 }
 0x328   :  { %v423_v23 = vadd.f32 1e-05, %v421_v22 }
 0x329   :  { %v420_v24 = vpop.xlane.xlu1 %419 }
 0x32a   :  { %1731 = vrsqrt.f32 %v423_v23  ;;  %v422_v25 = vmul.f32 0.001953125, %v420_v24 }
 0x32c   :  { %v424_v26 = vadd.f32 1e-05, %v422_v25 }
 0x32e   :  { %1733 = vrsqrt.f32 %v424_v26 }
 0x334   :  { %v1732_v27 = vpop.eup %1731 }
 0x335   :  { %v428_v28 = vmul.f32 %v1732_v27, %v396_v61  ;;  %v430_v29 = vmul.f32 %v1732_v27, %v398_v0  ;;  %v1982_v43 = vmul.f32 %v1732_v27, %v395_v60  ;;  %v1987_v49 = vmul.f32 %v1732_v27, %v397_v62 }
 0x336   :  { %v1866_v60 = vmov -1.0  }
 0x337   :  { %v444_v30 = vmul.f32 0.70710677, %v428_v28  ;;  %v446_v31 = vmul.f32 0.70710677, %v430_v29  ;;  %v1990_v52 = vmul.f32 0.70710677, %v1982_v43 }
 0x338   :  { %v1734_v32 = vpop.eup %1733  ;;  %v1995_v57 = vmul.f32 0.5, %v428_v28  ;;  %v1997_v58 = vmul.f32 0.5, %v430_v29  ;;  %v2000_v59 = vmul.f32 0.70710677, %v1987_v49 }
 0x339   :  { %v432_v33 = vmul.f32 %v1734_v32, %v400_v7  ;;  %v468_v34 = vand.u32 2147483647, %v444_v30  ;;  %v434_v35 = vmul.f32 %v1734_v32, %v402_v12  ;;  %v470_v36 = vand.u32 2147483647, %v446_v31 }
 0x33a   :  { %v1985_v46 = vmul.f32 %v1734_v32, %v399_v6  ;;  %vm452_vm11 = vcmp.ge.f32.partialorder %v444_v30, 0.0  ;;  %vm454_vm12 = vcmp.ge.f32.partialorder %v446_v31, 0.0  ;;  %v467_v63 = vand.u32 2147483647, %v1990_v52 }
 0x33b   :  { %v448_v37 = vmul.f32 0.70710677, %v432_v33  ;;  %v476_v38 = vmul.f32 0.3275911, %v468_v34  ;;  %v1980_v39 = vmul.f32 0.70710677, %v434_v35  ;;  %v2008_v3 = vmul.f32 %v1734_v32, %v1976_v9 }
 0x33c   :  { %v478_v40 = vmul.f32 0.3275911, %v470_v36  ;;  %v572_v51 = vsub.f32 0.0, %v468_v34  ;;  %v1993_v54 = vmul.f32 0.70710677, %v1985_v46  ;;  %v574_v56 = vsub.f32 0.0, %v470_v36 }
 0x33d   :  { %v472_v41 = vand.u32 2147483647, %v448_v37  ;;  %v484_v42 = vadd.f32 1.0, %v476_v38  ;;  %v474_v44 = vand.u32 2147483647, %v1980_v39  ;;  %v2003_v61 = vsel %vm452_vm11, 1.0, %v1866_v60 }
 0x33e   :  { %v486_v45 = vadd.f32 1.0, %v478_v40  ;;  %v580_v62 = vmul.f32 %v572_v51, %v468_v34  ;;  %vm456_vm13 = vcmp.ge.f32.partialorder %v448_v37, 0.0  ;;  %v471_v2 = vand.u32 2147483647, %v1993_v54 }
 0x33f   :  { %v480_v47 = vmul.f32 0.3275911, %v472_v41  ;;  %1735 = vrcp.f32 %v484_v42  ;;  %v482_v48 = vmul.f32 0.3275911, %v474_v44  ;;  %v576_v55 = vsub.f32 0.0, %v472_v41 }
 0x340   :  { %1737 = vrcp.f32 %v486_v45  ;;  %v578_v0 = vsub.f32 0.0, %v474_v44  ;;  %v2010_v4 = vmul.f32 0.5, %v432_v33  ;;  %v582_v6 = vmul.f32 %v574_v56, %v470_v36 }
 0x341   :  { %v488_v50 = vadd.f32 1.0, %v480_v47  ;;  %v490_v53 = vadd.f32 1.0, %v482_v48  ;;  %v584_v5 = vmul.f32 %v576_v55, %v472_v41  ;;  %v475_v7 = vmul.f32 0.3275911, %v467_v63 }
 0x342   :  { %v2012_v8 = vmul.f32 0.5, %v434_v35  ;;  %v2015_v10 = vsel %vm454_vm12, 1.0, %v1866_v60  ;;  %v479_v11 = vmul.f32 0.3275911, %v471_v2  ;;  %v2018_v12 = vmul.f32 0.70710677, %v2008_v3 }
 0x343   :  { %1739 = vrcp.f32 %v488_v50  ;;  %v2023_v14 = vsel %vm456_vm13, 1.0, %v1866_v60  ;;  %v589_v9 = vmul.f32 1.442695, %v580_v62  ;;  %v483_v15 = vadd.f32 1.0, %v475_v7 }
 0x344   :  { %1741 = vrcp.f32 %v490_v53  ;;  %v469_v16 = vand.u32 2147483647, %v2000_v59  ;;  %vm458_vm14 = vcmp.ge.f32.partialorder %v1980_v39, 0.0  ;;  %v586_v19 = vmul.f32 %v578_v0, %v474_v44 }
 0x345   :  { %v487_v20 = vadd.f32 1.0, %v479_v11  ;;  %v597_v21 = vmul.f32 1.442695, %v584_v5  ;;  %v593_v23 = vmul.f32 1.442695, %v582_v6  ;;  %1743 = vrcp.f32 %v483_v15 }
 0x346   :  { %v571_v25 = vsub.f32 0.0, %v467_v63  ;;  %v473_v26 = vand.u32 2147483647, %v2018_v12  ;;  %v575_v29 = vsub.f32 0.0, %v471_v2  ;;  %v477_v30 = vmul.f32 0.3275911, %v469_v16 }
 0x347   :  { %1745 = vrcp.f32 %v487_v20  ;;  %v601_v34 = vmul.f32 1.442695, %v586_v19  ;;  %v573_v53 = vsub.f32 0.0, %v469_v16  ;;  %v2045_v55 = vsel %vm458_vm14, 1.0, %v1866_v60 }
 0x348   :  { %1747 = vpow2.f32 %v589_v9  ;;  %v481_v35 = vmul.f32 0.3275911, %v473_v26  ;;  %v485_v38 = vadd.f32 1.0, %v477_v30  ;;  %v579_v42 = vmul.f32 %v571_v25, %v467_v63 }
 0x349   :  { %v2020_v13 = vpop.eup %1735  ;;  %1749 = vpow2.f32 %v593_v23  ;;  %v583_v48 = vmul.f32 %v575_v29, %v471_v2  ;;  %v577_v63 = vsub.f32 0.0, %v473_v26  ;;  %v581_v20 = vmul.f32 %v573_v53, %v469_v16 }
 0x34a   :  { %v2026_v17 = vpop.eup %1737  ;;  %v500_v18 = vmul.f32 1.0614054, %v2020_v13  ;;  %v489_v44 = vadd.f32 1.0, %v481_v35  ;;  %1751 = vrcp.f32 %v485_v38  ;;  %v587_v2 = vmul.f32 1.442695, %v579_v42 }
 0x34b   :  { %v502_v22 = vmul.f32 1.0614054, %v2026_v17  ;;  %v595_v9 = vmul.f32 1.442695, %v583_v48  ;;  %v585_v25 = vmul.f32 %v577_v63, %v473_v26  ;;  %v591_v38 = vmul.f32 1.442695, %v581_v20 }
 0x34c   :  { %v508_v24 = vadd.f32 -1.4531521, %v500_v18  ;;  %1753 = vrcp.f32 %v489_v44  ;;  %vm451_vm15 = vcmp.ge.f32.partialorder %v1990_v52, 0.0  ;;  %vm455_vm1 = vcmp.ge.f32.partialorder %v1993_v54, 0.0 }
 0x34d   :  { %v2032_v27 = vpop.eup %1739  ;;  %v510_v28 = vadd.f32 -1.4531521, %v502_v22  ;;  %1755 = vpow2.f32 %v597_v21  ;;  %v599_v44 = vmul.f32 1.442695, %v585_v25  ;;  %vm453_vm0 = vcmp.ge.f32.partialorder %v2000_v59, 0.0 }
 0x34e   :  { %v2034_v31 = vpop.eup %1741  ;;  %v504_v32 = vmul.f32 1.0614054, %v2032_v27  ;;  %v516_v33 = vmul.f32 %v2020_v13, %v508_v24  ;;  %1757 = vpow2.f32 %v601_v34  ;;  %vm457_vm2 = vcmp.ge.f32.partialorder %v2018_v12, 0.0 }
 0x34f   :  { %v506_v36 = vmul.f32 1.0614054, %v2034_v31  ;;  %v518_v37 = vmul.f32 %v2026_v17, %v510_v28  ;;  %v2049_v6 = vpop.eup %1743  ;;  %1759 = vpow2.f32 %v587_v2  ;;  %v437_v59 = vmul.f32 0.5, %v1987_v49 }
 0x350   :  { %v512_v40 = vadd.f32 -1.4531521, %v504_v32  ;;  %v524_v41 = vadd.f32 1.4214138, %v516_v33  ;;  %v499_v19 = vmul.f32 1.0614054, %v2049_v6  ;;  %1761 = vpow2.f32 %v595_v9 }
 0x351   :  { %v514_v45 = vadd.f32 -1.4531521, %v506_v36  ;;  %v526_v47 = vadd.f32 1.4214138, %v518_v37  ;;  %v2051_v15 = vpop.eup %1745  ;;  %1763 = vpow2.f32 %v591_v38  ;;  %v441_v12 = vmul.f32 0.5, %v2008_v3 }
 0x352   :  { %v520_v50 = vmul.f32 %v2032_v27, %v512_v40  ;;  %v532_v51 = vmul.f32 %v2020_v13, %v524_v41  ;;  %v1748_v22 = vpop.eup %1747  ;;  %v503_v24 = vmul.f32 1.0614054, %v2051_v15  ;;  %v507_v30 = vadd.f32 -1.4531521, %v499_v19 }
 0x353   :  { %v522_v56 = vmul.f32 %v2034_v31, %v514_v45  ;;  %v534_v62 = vmul.f32 %v2026_v17, %v526_v47  ;;  %v1750_v32 = vpop.eup %1749  ;;  %1765 = vpow2.f32 %v599_v44 }
 0x354   :  { %v528_v0 = vadd.f32 1.4214138, %v520_v50  ;;  %v540_v5 = vadd.f32 -0.28449672, %v532_v51  ;;  %v511_v35 = vadd.f32 -1.4531521, %v503_v24  ;;  %v515_v37 = vmul.f32 %v2049_v6, %v507_v30  ;;  %v2062_v40 = vpop.eup %1751 }
 0x355   :  { %v530_v7 = vadd.f32 1.4214138, %v522_v56  ;;  %v542_v11 = vadd.f32 -0.28449672, %v534_v62  ;;  %v501_v51 = vmul.f32 1.0614054, %v2062_v40 }
 0x356   :  { %v536_v39 = vmul.f32 %v2032_v27, %v528_v0  ;;  %v548_v18 = vmul.f32 %v2020_v13, %v540_v5  ;;  %v519_v42 = vmul.f32 %v2051_v15, %v511_v35  ;;  %v2067_v45 = vpop.eup %1753  ;;  %v523_v50 = vadd.f32 1.4214138, %v515_v37 }
 0x357   :  { %v538_v23 = vmul.f32 %v2034_v31, %v530_v7  ;;  %v550_v21 = vmul.f32 %v2026_v17, %v542_v11  ;;  %v505_v62 = vmul.f32 1.0614054, %v2067_v45  ;;  %v1756_v63 = vpop.eup %1755  ;;  %v509_v2 = vadd.f32 -1.4531521, %v501_v51 }
 0x358   :  { %v544_v28 = vadd.f32 -0.28449672, %v536_v39  ;;  %v556_v29 = vadd.f32 0.2548296, %v548_v18  ;;  %v527_v56 = vadd.f32 1.4214138, %v519_v42  ;;  %v1758_v7 = vpop.eup %1757 }
 0x359   :  { %v546_v33 = vadd.f32 -0.28449672, %v538_v23  ;;  %v558_v34 = vadd.f32 0.2548296, %v550_v21  ;;  %v513_v18 = vadd.f32 -1.4531521, %v505_v62  ;;  %v517_v23 = vmul.f32 %v2062_v40, %v509_v2 }
 0x35a   :  { %v552_v36 = vmul.f32 %v2032_v27, %v544_v28  ;;  %v564_v16 = vmul.f32 %v2020_v13, %v556_v29  ;;  %v535_v39 = vmul.f32 %v2051_v15, %v527_v56  ;;  %v1760_v28 = vpop.eup %1759 }
 0x35b   :  { %v554_v26 = vmul.f32 %v2034_v31, %v546_v33  ;;  %v566_v41 = vmul.f32 %v2026_v17, %v558_v34  ;;  %v531_v17 = vmul.f32 %v2049_v6, %v523_v50  ;;  %v521_v25 = vmul.f32 %v2067_v45, %v513_v18 }
 0x35c   :  { %v560_v47 = vadd.f32 0.2548296, %v552_v36  ;;  %v604_v48 = vmul.f32 %v1748_v22, %v564_v16  ;;  %v543_v24 = vadd.f32 -0.28449672, %v535_v39  ;;  %v525_v30 = vadd.f32 1.4214138, %v517_v23 }
 0x35d   :  { %v562_v13 = vadd.f32 0.2548296, %v554_v26  ;;  %v606_v53 = vmul.f32 %v1750_v32, %v566_v41  ;;  %v539_v22 = vadd.f32 -0.28449672, %v531_v17  ;;  %v1762_v32 = vpop.eup %1761 }
 0x35e   :  { %v568_v0 = vmul.f32 %v2032_v27, %v560_v47  ;;  %v612_v5 = vsub.f32 1.0, %v604_v48  ;;  %v551_v34 = vmul.f32 %v2051_v15, %v543_v24  ;;  %v461_v24 = vsel %vm453_vm0, 1.0, %v1866_v60 }
 0x35f   :  { %v570_v11 = vmul.f32 %v2034_v31, %v562_v13  ;;  %v614_v9 = vsub.f32 1.0, %v606_v53  ;;  %v547_v31 = vmul.f32 %v2049_v6, %v539_v22  ;;  %v439_v22 = vmul.f32 0.5, %v1985_v46  ;;  %v1725_v46 = vld [vmem:[%s2622_s3] sm:$0xff]  }
 0x360   :  { %v608_v19 = vmul.f32 %v1756_v63, %v568_v0  ;;  %v620_v20 = vmul.f32 %v612_v5, %v2003_v61  ;;  %v529_v61 = vadd.f32 1.4214138, %v521_v25  ;;  %v559_v41 = vadd.f32 0.2548296, %v551_v34 }
 0x361   :  { %v610_v21 = vmul.f32 %v1758_v7, %v570_v11  ;;  %v622_v27 = vmul.f32 %v614_v9, %v2015_v10  ;;  %v555_v16 = vadd.f32 0.2548296, %v547_v31  ;;  %v533_v10 = vmul.f32 %v2062_v40, %v525_v30  ;;  %v1764_v7 = vpop.eup %1763 }
 0x362   :  { %v616_v29 = vsub.f32 1.0, %v608_v19  ;;  %v628_v36 = vadd.f32 1.0, %v620_v20  ;;  %v537_v42 = vmul.f32 %v2067_v45, %v529_v61  ;;  %v1766_v9 = vpop.eup %1765  ;;  %v435_v19 = vmul.f32 0.5, %v1982_v43  ;;  %v1726_v61 = vld [vmem:[%s2622_s3 + $0x8] sm:$0xff]  }
 0x363   :  { %v618_v33 = vsub.f32 1.0, %v610_v21  ;;  %v630_v26 = vadd.f32 1.0, %v622_v27  ;;  %v563_v38 = vmul.f32 %v2049_v6, %v555_v16  ;;  %v541_v48 = vadd.f32 -0.28449672, %v533_v10 }
 0x364   :  { %v624_v35 = vmul.f32 %v616_v29, %v2023_v14  ;;  %v567_v14 = vmul.f32 %v2051_v15, %v559_v41  ;;  %v545_v44 = vadd.f32 -0.28449672, %v537_v42  ;;  %v636_v51 = vmul.f32 %v628_v36, %v1995_v57 }
 0x365   :  { %v626_v37 = vmul.f32 %v618_v33, %v2045_v55  ;;  %v603_v13 = vmul.f32 %v1760_v28, %v563_v38  ;;  %v549_v53 = vmul.f32 %v2062_v40, %v541_v48  ;;  %v638_v56 = vmul.f32 %v630_v26, %v1997_v58 }
 0x366   :  { %v632_v47 = vadd.f32 1.0, %v624_v35  ;;  %v607_v63 = vmul.f32 %v1762_v32, %v567_v14  ;;  %v553_v6 = vmul.f32 %v2067_v45, %v545_v44  ;;  %v459_v57 = vsel %vm451_vm15, 1.0, %v1866_v60 }
 0x367   :  { %v634_v50 = vadd.f32 1.0, %v626_v37  ;;  %v611_v5 = vsub.f32 1.0, %v603_v13  ;;  %v557_v17 = vadd.f32 0.2548296, %v549_v53  ;;  %v463_v58 = vsel %vm455_vm1, 1.0, %v1866_v60 }
 0x368   :  { %v640_v55 = vmul.f32 %v632_v47, %v2010_v4  ;;  %v615_v15 = vsub.f32 1.0, %v607_v63  ;;  %v561_v4 = vadd.f32 0.2548296, %v553_v6 }
 0x369   :  { %v642_v62 = vmul.f32 %v634_v50, %v2012_v8  ;;  %v619_v8 = vmul.f32 %v611_v5, %v459_v57  ;;  %v565_v11 = vmul.f32 %v2062_v40, %v557_v17 }
 0x36a   :  { %v648_v0 = vpack.c.bf16 %v640_v55, %v636_v51  ;;  %v623_v39 = vmul.f32 %v615_v15, %v463_v58  ;;  %v569_v18 = vmul.f32 %v2067_v45, %v561_v4  ;;  %v465_v45 = vsel %vm457_vm2, 1.0, %v1866_v60 }
 0x36b   :  { %v650_v2 = vpack.c.bf16 %v642_v62, %v638_v56  ;;  %v627_v52 = vadd.f32 1.0, %v619_v8  ;;  %v605_v20 = vmul.f32 %v1764_v7, %v565_v11 }
 0x36c   :  { %668 = vmatprep.subr.bf16.mxu0 %v648_v0  ;;  %v631_v23 = vadd.f32 1.0, %v623_v39  ;;  %v609_v54 = vmul.f32 %v1766_v9, %v569_v18 }
 0x36d   :  { %721 = vmatprep.subr.bf16.mxu1 %v650_v2  ;;  %v613_v21 = vsub.f32 1.0, %v605_v20  ;;  %v635_v27 = vmul.f32 %v627_v52, %v435_v19 }
 0x36e   :  { %v639_v40 = vmul.f32 %v631_v23, %v439_v22  ;;  %v617_v25 = vsub.f32 1.0, %v609_v54 }
 0x36f   :  { %v621_v28 = vmul.f32 %v613_v21, %v461_v24 }
 0x370   :  { %v647_v43 = vpack.c.bf16 %v639_v40, %v635_v27  ;;  %v625_v29 = vmul.f32 %v617_v25, %v465_v45 }
 0x371   :  { %v629_v31 = vadd.f32 1.0, %v621_v28 }
 0x372   :  { %669 = vmatpush1.bf16.msra.mxu0 %v647_v43  ;;  %v633_v30 = vadd.f32 1.0, %v625_v29 }
 0x373   :  { %v637_v32 = vmul.f32 %v629_v31, %v437_v59 }
 0x374   :  { %v641_v33 = vmul.f32 %v633_v30, %v441_v12 }
 0x375   :  { %1695 = vmatmul.mubr.msk.bf16.vlgmr.msra.gmra.mrb[8].mxu0 %vm661_vm3, %v1725_v46 }
 0x376   :  { %v649_v34 = vpack.c.bf16 %v641_v33, %v637_v32  ;;  %710 = vmatprep.mubr.bf16.mxu0 %v1864_v1 }
 0x378   :  { %722 = vmatpush1.bf16.msra.mxu1 %v649_v34 }
 0x37b   :  { %1697 = vmatmul.mubr.msk.bf16.vlgmr.msra.gmra.mrb[8].mxu1 %vm661_vm3, %v1725_v46 }
 0x37c   :  { %763 = vmatprep.mubr.bf16.mxu1 %v1864_v1 }
 0x37d   :  { %1696 = vmatmul.mubr.msk.bf16.gmra.mrb[12].mxu0 %vm661_vm3, %v1726_v61 }
 0x37e   :  { %1375 = vmatprep.mubr.bf16.mxu0 %v1864_v1 }
 0x383   :  { %1698 = vmatmul.mubr.msk.bf16.gmra.mrb[12].mxu1 %vm661_vm3, %v1726_v61 }
 0x384   :  { %1448 = vmatprep.mubr.bf16.mxu1 %v1864_v1 }
 0x448   :  { %v702_v49 = vpop.f32.mrb[8].mxu0 }
 0x449   :  { %v704_v3 = vpop.f32.mrb[9].mxu0 }
 0x44a   :  { %v774_v35 = vadd.f32 %v704_v3, %v702_v49  ;;  %v706_v36 = vpop.f32.mrb[10].mxu0 }
 0x44b   :  { %v708_v16 = vpop.f32.mrb[11].mxu0 }
 0x44c   :  { %v779_v10 = vadd.f32 %v708_v16, %v706_v36 }
 0x44e   :  { %v755_v37 = vpop.f32.mrb[8].mxu1 }
 0x44f   :  { %v757_v26 = vpop.f32.mrb[9].mxu1  ;;  %v775_v41 = vadd.f32 %v774_v35, %v755_v37 }
 0x450   :  { %v759_v42 = vpop.f32.mrb[10].mxu1  ;;  %v712_v47 = vpop.f32.mrb[12].mxu0 }
 0x451   :  { %v761_v38 = vpop.f32.mrb[11].mxu1  ;;  %v776_v48 = vadd.f32 %v775_v41, %v757_v26  ;;  %v714_v50 = vpop.f32.mrb[13].mxu0  ;;  %v780_v14 = vadd.f32 %v779_v10, %v759_v42 }
 0x452   :  { %v784_v44 = vadd.f32 %v714_v50, %v712_v47  ;;  %v716_v51 = vpop.f32.mrb[14].mxu0 }
 0x453   :  { %777 = vadd.xlane.f32.xlu0 %v776_v48  ;;  %v781_v55 = vadd.f32 %v780_v14, %v761_v38  ;;  %v718_v13 = vpop.f32.mrb[15].mxu0 }
 0x454   :  { %v789_v53 = vadd.f32 %v718_v13, %v716_v51 }
 0x455   :  { %782 = vadd.xlane.f32.xlu1 %v781_v55 }
 0x456   :  { %v765_v56 = vpop.f32.mrb[12].mxu1 }
 0x457   :  { %v767_v62 = vpop.f32.mrb[13].mxu1  ;;  %v785_v63 = vadd.f32 %v784_v44, %v765_v56 }
 0x458   :  { %v769_v6 = vpop.f32.mrb[14].mxu1 }
 0x459   :  { %v771_v0 = vpop.f32.mrb[15].mxu1  ;;  %v786_v5 = vadd.f32 %v785_v63, %v767_v62  ;;  %v790_v17 = vadd.f32 %v789_v53, %v769_v6 }
 0x45b   :  { %787 = vadd.xlane.f32.xlu0 %v786_v5  ;;  %v791_v2 = vadd.f32 %v790_v17, %v771_v0 }
 0x45d   :  { %792 = vadd.xlane.f32.xlu1 %v791_v2 }
 0x4e0   :  { %v778_v57 = vpop.xlane.xlu0 %777 }
 0x4e1   :  { %v794_v15 = vmul.f32 0.001953125, %v778_v57 }
 0x4e2   :  { %v783_v4 = vpop.xlane.xlu1 %782 }
 0x4e3   :  { %v2121_v7 = vsub.f32 %v702_v49, %v794_v15  ;;  %v2123_v58 = vsub.f32 %v704_v3, %v794_v15  ;;  %v795_v8 = vmul.f32 0.001953125, %v783_v4  ;;  %v2125_v11 = vsub.f32 %v755_v37, %v794_v15 }
 0x4e4   :  { %v801_v9 = vsub.f32 %v757_v26, %v794_v15 }
 0x4e5   :  { %v2127_v39 = vsub.f32 %v706_v36, %v795_v8  ;;  %v2129_v18 = vsub.f32 %v708_v16, %v795_v8  ;;  %v814_v19 = vmul.f32 %v2121_v7, %v2121_v7  ;;  %v815_v52 = vmul.f32 %v2123_v58, %v2123_v58 }
 0x4e6   :  { %v2135_v20 = vsub.f32 %v759_v42, %v795_v8  ;;  %v816_v22 = vmul.f32 %v2125_v11, %v2125_v11  ;;  %v805_v40 = vsub.f32 %v761_v38, %v795_v8  ;;  %v817_v25 = vmul.f32 %v801_v9, %v801_v9 }
 0x4e7   :  { %v830_v23 = vadd.f32 %v815_v52, %v814_v19  ;;  %v818_v54 = vmul.f32 %v2127_v39, %v2127_v39  ;;  %v819_v21 = vmul.f32 %v2129_v18, %v2129_v18 }
 0x4e8   :  { %v788_v27 = vpop.xlane.xlu0 %787  ;;  %v820_v29 = vmul.f32 %v2135_v20, %v2135_v20  ;;  %v821_v30 = vmul.f32 %v805_v40, %v805_v40 }
 0x4e9   :  { %v796_v24 = vmul.f32 0.001953125, %v788_v27  ;;  %v831_v45 = vadd.f32 %v830_v23, %v816_v22  ;;  %v835_v28 = vadd.f32 %v819_v21, %v818_v54 }
 0x4ea   :  { %v793_v43 = vpop.xlane.xlu1 %792 }
 0x4eb   :  { %v2145_v31 = vsub.f32 %v712_v47, %v796_v24  ;;  %v2147_v46 = vsub.f32 %v714_v50, %v796_v24  ;;  %v797_v59 = vmul.f32 0.001953125, %v793_v43  ;;  %v832_v12 = vadd.f32 %v831_v45, %v817_v25 }
 0x4ec   :  { %v836_v32 = vadd.f32 %v835_v28, %v820_v29  ;;  %v2149_v33 = vsub.f32 %v765_v56, %v796_v24  ;;  %v2151_v34 = vsub.f32 %v767_v62, %v796_v24 }
 0x4ed   :  { %v2153_v61 = vsub.f32 %v716_v51, %v797_v59  ;;  %v2155_v49 = vsub.f32 %v718_v13, %v797_v59  ;;  %833 = vadd.xlane.f32.xlu0 %v832_v12  ;;  %v822_v3 = vmul.f32 %v2145_v31, %v2145_v31  ;;  %v823_v35 = vmul.f32 %v2147_v46, %v2147_v46 }
 0x4ee   :  { %v837_v36 = vadd.f32 %v836_v32, %v821_v30  ;;  %v824_v16 = vmul.f32 %v2149_v33, %v2149_v33  ;;  %v2163_v10 = vsub.f32 %v769_v6, %v797_v59  ;;  %v2165_v26 = vsub.f32 %v771_v0, %v797_v59 }
 0x4ef   :  { %v840_v37 = vadd.f32 %v823_v35, %v822_v3  ;;  %v826_v41 = vmul.f32 %v2153_v61, %v2153_v61  ;;  %v827_v42 = vmul.f32 %v2155_v49, %v2155_v49  ;;  %v825_v47 = vmul.f32 %v2151_v34, %v2151_v34 }
 0x4f0   :  { %838 = vadd.xlane.f32.xlu1 %v837_v36  ;;  %v828_v48 = vmul.f32 %v2163_v10, %v2163_v10  ;;  %v829_v44 = vmul.f32 %v2165_v26, %v2165_v26 }
 0x4f1   :  { %v841_v38 = vadd.f32 %v840_v37, %v824_v16  ;;  %v845_v50 = vadd.f32 %v827_v42, %v826_v41 }
 0x4f3   :  { %v842_v14 = vadd.f32 %v841_v38, %v825_v47  ;;  %v846_v51 = vadd.f32 %v845_v50, %v828_v48 }
 0x4f5   :  { %843 = vadd.xlane.f32.xlu0 %v842_v14  ;;  %v847_v55 = vadd.f32 %v846_v51, %v829_v44 }
 0x4f7   :  { %848 = vadd.xlane.f32.xlu1 %v847_v55 }
 0x57a   :  { %v834_v13 = vpop.xlane.xlu0 %833 }
 0x57b   :  { %v850_v53 = vmul.f32 0.001953125, %v834_v13 }
 0x57d   :  { %v854_v56 = vadd.f32 1e-05, %v850_v53  ;;  %v839_v62 = vpop.xlane.xlu1 %838 }
 0x57e   :  { %v851_v63 = vmul.f32 0.001953125, %v839_v62 }
 0x57f   :  { %1767 = vrsqrt.f32 %v854_v56 }
 0x580   :  { %v855_v6 = vadd.f32 1e-05, %v851_v63 }
 0x582   :  { %1769 = vrsqrt.f32 %v855_v6  ;;  %v844_v0 = vpop.xlane.xlu0 %843 }
 0x583   :  { %v852_v2 = vmul.f32 0.001953125, %v844_v0 }
 0x584   :  { %v849_v5 = vpop.xlane.xlu1 %848 }
 0x585   :  { %v853_v4 = vmul.f32 0.001953125, %v849_v5  ;;  %v856_v54 = vadd.f32 1e-05, %v852_v2 }
 0x587   :  { %v857_v24 = vadd.f32 1e-05, %v853_v4  ;;  %1771 = vrsqrt.f32 %v856_v54 }
 0x589   :  { %v1768_v17 = vpop.eup %1767  ;;  %1773 = vrsqrt.f32 %v857_v24 }
 0x58a   :  { %v863_v57 = vmul.f32 %v1768_v17, %v2123_v58  ;;  %v865_v15 = vmul.f32 %v1768_v17, %v801_v9  ;;  %v2203_v42 = vmul.f32 %v1768_v17, %v2125_v11 }
 0x58c   :  { %v1770_v8 = vpop.eup %1769  ;;  %v895_v19 = vmul.f32 0.70710677, %v863_v57  ;;  %v2178_v52 = vmul.f32 0.70710677, %v865_v15  ;;  %v2197_v37 = vmul.f32 0.5, %v863_v57  ;;  %v2205_v38 = vmul.f32 0.5, %v865_v15 }
 0x58d   :  { %v867_v22 = vmul.f32 %v1770_v8, %v2129_v18  ;;  %v2181_v23 = vmul.f32 %v1770_v8, %v805_v40  ;;  %v2191_v18 = vmul.f32 %v1768_v17, %v2121_v7  ;;  %v2195_v32 = vmul.f32 %v1770_v8, %v2127_v39 }
 0x58e   :  { %v943_v21 = vand.u32 2147483647, %v895_v19  ;;  %v945_v27 = vand.u32 2147483647, %v2178_v52  ;;  %vm911_vm4 = vcmp.ge.f32.partialorder %v895_v19, 0.0  ;;  %vm913_vm5 = vcmp.ge.f32.partialorder %v2178_v52, 0.0 }
 0x58f   :  { %v2184_v25 = vmul.f32 0.70710677, %v867_v22  ;;  %v2187_v58 = vmul.f32 0.70710677, %v2181_v23  ;;  %v2200_v7 = vmul.f32 0.70710677, %v2191_v18  ;;  %v2213_v51 = vmul.f32 %v1770_v8, %v2135_v20 }
 0x590   :  { %v959_v45 = vmul.f32 0.3275911, %v943_v21  ;;  %v1151_v28 = vsub.f32 0.0, %v943_v21  ;;  %v961_v43 = vmul.f32 0.3275911, %v945_v27  ;;  %v1153_v16 = vsub.f32 0.0, %v945_v27 }
 0x591   :  { %v947_v9 = vand.u32 2147483647, %v2184_v25  ;;  %v949_v12 = vand.u32 2147483647, %v2187_v58  ;;  %v2208_v39 = vmul.f32 0.70710677, %v2195_v32  ;;  %v2221_v6 = vpop.eup %1771 }
 0x592   :  { %v975_v29 = vadd.f32 1.0, %v959_v45  ;;  %v977_v30 = vadd.f32 1.0, %v961_v43  ;;  %v1167_v35 = vmul.f32 %v1151_v28, %v943_v21  ;;  %v942_v50 = vand.u32 2147483647, %v2200_v7 }
 0x593   :  { %v963_v40 = vmul.f32 0.3275911, %v947_v9  ;;  %v1155_v59 = vsub.f32 0.0, %v947_v9  ;;  %v965_v36 = vmul.f32 0.3275911, %v949_v12  ;;  %v1157_v41 = vsub.f32 0.0, %v949_v12  ;;  %v2224_v17 = vpop.eup %1773 }
 0x594   :  { %1775 = vrcp.f32 %v975_v29  ;;  %v1184_v14 = vmul.f32 1.442695, %v1167_v35  ;;  %v1169_v44 = vmul.f32 %v1153_v16, %v945_v27  ;;  %v946_v55 = vand.u32 2147483647, %v2208_v39 }
 0x595   :  { %v979_v3 = vadd.f32 1.0, %v963_v40  ;;  %v1171_v47 = vmul.f32 %v1155_v59, %v947_v9  ;;  %v981_v48 = vadd.f32 1.0, %v965_v36  ;;  %v1173_v11 = vmul.f32 %v1157_v41, %v949_v12 }
 0x596   :  { %v958_v13 = vmul.f32 0.3275911, %v942_v50  ;;  %v2216_v53 = vmul.f32 0.5, %v867_v22  ;;  %v2219_v56 = vsel %vm911_vm4, 1.0, %v1866_v60  ;;  %v1150_v63 = vsub.f32 0.0, %v942_v50 }
 0x597   :  { %1777 = vrcp.f32 %v979_v3  ;;  %v1192_v62 = vmul.f32 1.442695, %v1171_v47  ;;  %vm915_vm6 = vcmp.ge.f32.partialorder %v2184_v25, 0.0  ;;  %v962_v0 = vmul.f32 0.3275911, %v946_v55 }
 0x598   :  { %1779 = vrcp.f32 %v977_v30  ;;  %v974_v5 = vadd.f32 1.0, %v958_v13  ;;  %v1154_v20 = vsub.f32 0.0, %v946_v55  ;;  %v1188_v2 = vmul.f32 1.442695, %v1169_v44 }
 0x599   :  { %1781 = vrcp.f32 %v981_v48  ;;  %v2227_v57 = vmul.f32 0.70710677, %v2203_v42  ;;  %v2230_v15 = vmul.f32 0.70710677, %v2213_v51  ;;  %v1196_v8 = vmul.f32 1.442695, %v1173_v11 }
 0x59a   :  { %1783 = vpow2.f32 %v1184_v14  ;;  %v978_v19 = vadd.f32 1.0, %v962_v0  ;;  %v1166_v22 = vmul.f32 %v1150_v63, %v942_v50  ;;  %v2236_v21 = vmul.f32 0.5, %v2181_v23 }
 0x59b   :  { %1785 = vrcp.f32 %v974_v5  ;;  %vm917_vm7 = vcmp.ge.f32.partialorder %v2187_v58, 0.0  ;;  %v2242_v27 = vsel %vm915_vm6, 1.0, %v1866_v60  ;;  %v2247_v24 = vsel %vm913_vm5, 1.0, %v1866_v60 }
 0x59c   :  { %1787 = vpow2.f32 %v1192_v62  ;;  %v1170_v45 = vmul.f32 %v1154_v20, %v946_v55  ;;  %v944_v23 = vand.u32 2147483647, %v2227_v57  ;;  %v948_v58 = vand.u32 2147483647, %v2230_v15 }
 0x59d   :  { %1789 = vrcp.f32 %v978_v19  ;;  %v2257_v29 = vsel %vm917_vm7, 1.0, %v1866_v60  ;;  %v1182_v52 = vmul.f32 1.442695, %v1166_v22  ;;  %vm910_vm8 = vcmp.ge.f32.partialorder %v2200_v7, 0.0 }
 0x59e   :  { %v2232_v4 = vpop.eup %1775  ;;  %1791 = vpow2.f32 %v1188_v2  ;;  %v960_v12 = vmul.f32 0.3275911, %v944_v23  ;;  %v964_v30 = vmul.f32 0.3275911, %v948_v58  ;;  %v1190_v36 = vmul.f32 1.442695, %v1170_v45 }
 0x59f   :  { %v1007_v54 = vmul.f32 1.0614054, %v2232_v4  ;;  %1793 = vpow2.f32 %v1196_v8  ;;  %v1152_v16 = vsub.f32 0.0, %v944_v23  ;;  %v1156_v41 = vsub.f32 0.0, %v948_v58 }
 0x5a0   :  { %v2267_v14 = vmul.f32 %v2221_v6, %v2147_v46  ;;  %v976_v11 = vadd.f32 1.0, %v960_v12  ;;  %v980_v55 = vadd.f32 1.0, %v964_v30  ;;  %1795 = vpow2.f32 %v1182_v52 }
 0x5a1   :  { %v2249_v9 = vpop.eup %1777  ;;  %v1023_v28 = vadd.f32 -1.4531521, %v1007_v54  ;;  %v1168_v13 = vmul.f32 %v1152_v16, %v944_v23  ;;  %v1172_v8 = vmul.f32 %v1156_v41, %v948_v58  ;;  %v2276_v46 = vmul.f32 %v2224_v17, %v2155_v49 }
 0x5a2   :  { %v2253_v43 = vpop.eup %1779  ;;  %v1011_v25 = vmul.f32 1.0614054, %v2249_v9  ;;  %1797 = vrcp.f32 %v976_v11  ;;  %vm914_vm9 = vcmp.ge.f32.partialorder %v2208_v39, 0.0  ;;  %v878_v39 = vmul.f32 0.5, %v2191_v18 }
 0x5a3   :  { %v1039_v40 = vmul.f32 %v2232_v4, %v1023_v28  ;;  %v1009_v59 = vmul.f32 1.0614054, %v2253_v43  ;;  %v2261_v3 = vpop.eup %1781  ;;  %1799 = vrcp.f32 %v980_v55  ;;  %v1186_v52 = vmul.f32 1.442695, %v1168_v13 }
 0x5a4   :  { %v1027_v35 = vadd.f32 -1.4531521, %v1011_v25  ;;  %v1013_v48 = vmul.f32 1.0614054, %v2261_v3  ;;  %v1784_v62 = vpop.eup %1783  ;;  %1801 = vpow2.f32 %v1190_v36  ;;  %vm912_vm10 = vcmp.ge.f32.partialorder %v2227_v57, 0.0 }
 0x5a5   :  { %v1055_v47 = vadd.f32 1.4214138, %v1039_v40  ;;  %v1025_v50 = vadd.f32 -1.4531521, %v1009_v59  ;;  %v2272_v20 = vpop.eup %1785  ;;  %v2284_v40 = vmul.f32 0.70710677, %v2267_v14  ;;  %1803 = vpow2.f32 %v1186_v52 }
 0x5a6   :  { %v1043_v44 = vmul.f32 %v2249_v9, %v1027_v35  ;;  %v1029_v0 = vadd.f32 -1.4531521, %v1013_v48  ;;  %v1788_v19 = vpop.eup %1787  ;;  %v1006_v28 = vmul.f32 1.0614054, %v2272_v20  ;;  %vm916_vm11 = vcmp.ge.f32.partialorder %v2230_v15, 0.0 }
 0x5a7   :  { %v1071_v63 = vmul.f32 %v2232_v4, %v1055_v47  ;;  %v1041_v5 = vmul.f32 %v2253_v43, %v1025_v50  ;;  %v2280_v23 = vpop.eup %1789  ;;  %v1194_v47 = vmul.f32 1.442695, %v1172_v8  ;;  %v928_v57 = vsel %vm912_vm10, 1.0, %v1866_v60 }
 0x5a8   :  { %v1059_v2 = vadd.f32 1.4214138, %v1043_v44  ;;  %v1045_v54 = vmul.f32 %v2261_v3, %v1029_v0  ;;  %v1792_v58 = vpop.eup %1791  ;;  %v1010_v30 = vmul.f32 1.0614054, %v2280_v23  ;;  %v1022_v41 = vadd.f32 -1.4531521, %v1006_v28 }
 0x5a9   :  { %v1087_v22 = vadd.f32 -0.28449672, %v1071_v63  ;;  %v1057_v45 = vadd.f32 1.4214138, %v1041_v5  ;;  %v1794_v35 = vpop.eup %1793  ;;  %v2293_v63 = vmul.f32 0.70710677, %v2276_v46  ;;  %1805 = vpow2.f32 %v1194_v47 }
 0x5aa   :  { %v1075_v25 = vmul.f32 %v2249_v9, %v1059_v2  ;;  %v1061_v59 = vadd.f32 1.4214138, %v1045_v54  ;;  %v1026_v11 = vadd.f32 -1.4531521, %v1010_v30  ;;  %v1038_v13 = vmul.f32 %v2272_v20, %v1022_v41 }
 0x5ab   :  { %v1103_v49 = vmul.f32 %v2232_v4, %v1087_v22  ;;  %v1073_v12 = vmul.f32 %v2253_v43, %v1057_v45  ;;  %v2301_v22 = vsel %vm910_vm8, 1.0, %v1866_v60  ;;  %v1796_v45 = vpop.eup %1795  ;;  %v2309_v30 = vand.u32 2147483647, %v2284_v40 }
 0x5ac   :  { %v1091_v16 = vadd.f32 -0.28449672, %v1075_v25  ;;  %v1077_v50 = vmul.f32 %v2261_v3, %v1061_v59  ;;  %v1042_v36 = vmul.f32 %v2280_v23, %v1026_v11  ;;  %v1054_v54 = vadd.f32 1.4214138, %v1038_v13 }
 0x5ad   :  { %v1119_v48 = vadd.f32 0.2548296, %v1103_v49  ;;  %v1089_v44 = vadd.f32 -0.28449672, %v1073_v12  ;;  %v2312_v7 = vand.u32 2147483647, %v2293_v63 }
 0x5ae   :  { %v1107_v55 = vmul.f32 %v2249_v9, %v1091_v16  ;;  %v1093_v5 = vadd.f32 -0.28449672, %v1077_v50  ;;  %v1058_v49 = vadd.f32 1.4214138, %v1042_v36  ;;  %v1070_v12 = vmul.f32 %v2272_v20, %v1054_v54 }
 0x5af   :  { %v1135_v0 = vmul.f32 %v2232_v4, %v1119_v48  ;;  %v1105_v2 = vmul.f32 %v2253_v43, %v1089_v44  ;;  %v2304_v4 = vpop.eup %1797  ;;  %v967_v11 = vmul.f32 0.3275911, %v2309_v30  ;;  %v932_v15 = vsel %vm916_vm11, 1.0, %v1866_v60 }
 0x5b0   :  { %v1123_v8 = vadd.f32 0.2548296, %v1107_v55  ;;  %v1109_v25 = vmul.f32 %v2261_v3, %v1093_v5  ;;  %v1074_v47 = vmul.f32 %v2280_v23, %v1058_v49  ;;  %v2316_v48 = vpop.eup %1799  ;;  %v1086_v44 = vadd.f32 -0.28449672, %v1070_v12 }
 0x5b1   :  { %v1215_v28 = vmul.f32 %v1784_v62, %v1135_v0  ;;  %v1121_v52 = vadd.f32 0.2548296, %v1105_v2  ;;  %v1802_v2 = vpop.eup %1801  ;;  %vm919_vm12 = vcmp.ge.f32.partialorder %v2284_v40, 0.0  ;;  %vm923_vm13 = vcmp.ge.f32.partialorder %v2293_v63, 0.0 }
 0x5b2   :  { %v1139_v59 = vmul.f32 %v2249_v9, %v1123_v8  ;;  %v1125_v41 = vadd.f32 0.2548296, %v1109_v25  ;;  %v1008_v9 = vmul.f32 1.0614054, %v2304_v4  ;;  %v1090_v5 = vadd.f32 -0.28449672, %v1074_v47  ;;  %v1804_v49 = vpop.eup %1803 }
 0x5b3   :  { %v1231_v16 = vsub.f32 1.0, %v1215_v28  ;;  %v1137_v62 = vmul.f32 %v2253_v43, %v1121_v52  ;;  %v1102_v36 = vmul.f32 %v2272_v20, %v1086_v44  ;;  %v1012_v8 = vmul.f32 1.0614054, %v2316_v48  ;;  %v1806_v47 = vpop.eup %1805 }
 0x5b4   :  { %v1219_v50 = vmul.f32 %v1788_v19, %v1139_v59  ;;  %v1141_v13 = vmul.f32 %v2261_v3, %v1125_v41  ;;  %v1024_v19 = vadd.f32 -1.4531521, %v1008_v9  ;;  %v1106_v52 = vmul.f32 %v2280_v23, %v1090_v5 }
 0x5b5   :  { %v1247_v55 = vmul.f32 %v1231_v16, %v2219_v56  ;;  %v1217_v0 = vmul.f32 %v1792_v58, %v1137_v62  ;;  %v1118_v3 = vadd.f32 0.2548296, %v1102_v36  ;;  %v1028_v58 = vadd.f32 -1.4531521, %v1012_v8 }
 0x5b6   :  { %v1235_v43 = vsub.f32 1.0, %v1219_v50  ;;  %v1221_v28 = vmul.f32 %v1794_v35, %v1141_v13  ;;  %v1040_v59 = vmul.f32 %v2304_v4, %v1024_v19  ;;  %v1122_v62 = vadd.f32 0.2548296, %v1106_v52 }
 0x5b7   :  { %v1263_v54 = vadd.f32 1.0, %v1247_v55  ;;  %v1233_v25 = vsub.f32 1.0, %v1217_v0  ;;  %v1134_v35 = vmul.f32 %v2272_v20, %v1118_v3  ;;  %v1044_v44 = vmul.f32 %v2316_v48, %v1028_v58 }
 0x5b8   :  { %v1251_v56 = vmul.f32 %v1235_v43, %v2242_v27  ;;  %v1237_v16 = vsub.f32 1.0, %v1221_v28  ;;  %v1056_v9 = vadd.f32 1.4214138, %v1040_v59  ;;  %v1138_v13 = vmul.f32 %v2280_v23, %v1122_v62 }
 0x5b9   :  { %v1279_v12 = vmul.f32 %v1263_v54, %v2197_v37  ;;  %v1249_v41 = vmul.f32 %v1233_v25, %v2247_v24  ;;  %v971_v0 = vmul.f32 0.3275911, %v2312_v7  ;;  %v1214_v5 = vmul.f32 %v1796_v45, %v1134_v35 }
 0x5ba   :  { %v1267_v50 = vadd.f32 1.0, %v1251_v56  ;;  %v1253_v55 = vmul.f32 %v1237_v16, %v2257_v29  ;;  %v1060_v43 = vadd.f32 1.4214138, %v1044_v44  ;;  %v1072_v24 = vmul.f32 %v2304_v4, %v1056_v9 }
 0x5bb   :  { %v1265_v27 = vadd.f32 1.0, %v1249_v41  ;;  %v1218_v20 = vmul.f32 %v1802_v2, %v1138_v13  ;;  %v983_v19 = vadd.f32 1.0, %v967_v11  ;;  %v1230_v28 = vsub.f32 1.0, %v1214_v5 }
 0x5bc   :  { %v1283_v37 = vmul.f32 %v1267_v50, %v2216_v53  ;;  %v1269_v36 = vadd.f32 1.0, %v1253_v55  ;;  %v1076_v29 = vmul.f32 %v2316_v48, %v1060_v43  ;;  %v1088_v25 = vadd.f32 -0.28449672, %v1072_v24 }
 0x5bd   :  { %v1281_v8 = vmul.f32 %v1265_v27, %v2205_v38  ;;  %v1234_v52 = vsub.f32 1.0, %v1218_v20  ;;  %v987_v56 = vadd.f32 1.0, %v971_v0  ;;  %1807 = vrcp.f32 %v983_v19 }
 0x5be   :  { %v1303_v54 = vpack.c.bf16 %v1283_v37, %v1279_v12  ;;  %v1285_v23 = vmul.f32 %v1269_v36, %v2236_v21  ;;  %v930_v53 = vsel %vm914_vm9, 1.0, %v1866_v60  ;;  %v1246_v45 = vmul.f32 %v1230_v28, %v2301_v22 }
 0x5bf   :  { %v1092_v38 = vadd.f32 -0.28449672, %v1076_v29  ;;  %v1104_v11 = vmul.f32 %v2304_v4, %v1088_v25  ;;  %v1250_v3 = vmul.f32 %v1234_v52, %v930_v53  ;;  %1809 = vrcp.f32 %v987_v56 }
 0x5c0   :  { %1343 = vmatprep.subr.bf16.mxu0 %v1303_v54  ;;  %v1305_v2 = vpack.c.bf16 %v1285_v23, %v1281_v8  ;;  %v2347_v58 = vmul.f32 %v2221_v6, %v2151_v34  ;;  %v1262_v21 = vadd.f32 1.0, %v1246_v45  ;;  %v882_v16 = vmul.f32 0.5, %v2195_v32 }
 0x5c1   :  { %v1108_v59 = vmul.f32 %v2316_v48, %v1092_v38  ;;  %v1120_v12 = vadd.f32 0.2548296, %v1104_v11  ;;  %v1266_v22 = vadd.f32 1.0, %v1250_v3  ;;  %v2354_v41 = vmul.f32 %v2224_v17, %v2165_v26 }
 0x5c2   :  { %1416 = vmatprep.subr.bf16.mxu1 %v1305_v2  ;;  %v1278_v35 = vmul.f32 %v1262_v21, %v878_v39  ;;  %v1159_v44 = vsub.f32 0.0, %v2309_v30  ;;  %v2359_v9 = vmul.f32 0.70710677, %v2347_v58  ;;  %v1163_v27 = vsub.f32 0.0, %v2312_v7 }
 0x5c3   :  { %v1124_v62 = vadd.f32 0.2548296, %v1108_v59  ;;  %v1136_v50 = vmul.f32 %v2304_v4, %v1120_v12  ;;  %v1282_v34 = vmul.f32 %v1266_v22, %v882_v16  ;;  %v2364_v55 = vmul.f32 0.70710677, %v2354_v41 }
 0x5c4   :  { %v953_v4 = vand.u32 2147483647, %v2359_v9  ;;  %v880_v43 = vmul.f32 0.5, %v2203_v42  ;;  %v2383_v42 = vmul.f32 %v2221_v6, %v2145_v31  ;;  %v884_v56 = vmul.f32 0.5, %v2213_v51 }
 0x5c5   :  { %v1140_v18 = vmul.f32 %v2316_v48, %v1124_v62  ;;  %v1216_v32 = vmul.f32 %v1804_v49, %v1136_v50  ;;  %v1302_v26 = vpack.c.bf16 %v1282_v34, %v1278_v35  ;;  %v1175_v48 = vmul.f32 %v1159_v44, %v2309_v30 }
 0x5c6   :  { %v957_v49 = vand.u32 2147483647, %v2364_v55  ;;  %v969_v5 = vmul.f32 0.3275911, %v953_v4  ;;  %v2389_v11 = vmul.f32 %v2224_v17, %v2153_v61  ;;  %v2393_v31 = vmul.f32 0.70710677, %v2383_v42 }
 0x5c7   :  { %v1220_v13 = vmul.f32 %v1806_v47, %v1140_v18  ;;  %v1232_v0 = vsub.f32 1.0, %v1216_v32  ;;  %v2369_v37 = vpop.eup %1807  ;;  %1344 = vmatpush1.bf16.msra.mxu0 %v1302_v26  ;;  %v1179_v47 = vmul.f32 %v1163_v27, %v2312_v7  ;;  %v1200_v23 = vmul.f32 1.442695, %v1175_v48 }
 0x5c8   :  { %v1015_v8 = vmul.f32 1.0614054, %v2369_v37  ;;  %v973_v19 = vmul.f32 0.3275911, %v957_v49  ;;  %v985_v54 = vadd.f32 1.0, %v969_v5  ;;  %v1161_v22 = vsub.f32 0.0, %v953_v4 }
 0x5c9   :  { %v1236_v24 = vsub.f32 1.0, %v1220_v13  ;;  %v1248_v36 = vmul.f32 %v1232_v0, %v928_v57  ;;  %v2376_v20 = vpop.eup %1809  ;;  %v1208_v38 = vmul.f32 1.442695, %v1179_v47  ;;  %v2396_v51 = vmul.f32 0.70710677, %v2389_v11 }
 0x5ca   :  { %v1019_v30 = vmul.f32 1.0614054, %v2376_v20  ;;  %v1031_v25 = vadd.f32 -1.4531521, %v1015_v8  ;;  %v989_v52 = vadd.f32 1.0, %v973_v19  ;;  %1811 = vrcp.f32 %v985_v54 }
 0x5cb   :  { %v1252_v28 = vmul.f32 %v1236_v24, %v932_v15  ;;  %v1264_v29 = vadd.f32 1.0, %v1248_v36  ;;  %v2400_v61 = vand.u32 2147483647, %v2393_v31  ;;  %v2403_v62 = vand.u32 2147483647, %v2396_v51 }
 0x5cc   :  { %v1035_v45 = vadd.f32 -1.4531521, %v1019_v30  ;;  %v1047_v7 = vmul.f32 %v2369_v37, %v1031_v25  ;;  %1813 = vrcp.f32 %v989_v52  ;;  %v1165_v34 = vsub.f32 0.0, %v957_v49 }
 0x5cd   :  { %v1268_v53 = vadd.f32 1.0, %v1252_v28  ;;  %v1280_v2 = vmul.f32 %v1264_v29, %v880_v43  ;;  %1815 = vpow2.f32 %v1200_v23  ;;  %v966_v44 = vmul.f32 0.3275911, %v2400_v61 }
 0x5ce   :  { %v1051_v21 = vmul.f32 %v2376_v20, %v1035_v45  ;;  %v1063_v59 = vadd.f32 1.4214138, %v1047_v7  ;;  %1817 = vpow2.f32 %v1208_v38  ;;  %v970_v18 = vmul.f32 0.3275911, %v2403_v62 }
 0x5cf   :  { %v1284_v3 = vmul.f32 %v1268_v53, %v884_v56  ;;  %v2410_v32 = vmul.f32 %v2221_v6, %v2149_v33  ;;  %v1177_v0 = vmul.f32 %v1161_v22, %v953_v4  ;;  %v982_v57 = vadd.f32 1.0, %v966_v44 }
 0x5d0   :  { %v1067_v39 = vadd.f32 1.4214138, %v1051_v21  ;;  %v1079_v16 = vmul.f32 %v2369_v37, %v1063_v59  ;;  %v986_v48 = vadd.f32 1.0, %v970_v18  ;;  %v2417_v5 = vmul.f32 %v2224_v17, %v2163_v10 }
 0x5d1   :  { %v1304_v12 = vpack.c.bf16 %v1284_v3, %v1280_v2  ;;  %v1181_v36 = vmul.f32 %v1165_v34, %v957_v49  ;;  %1819 = vrcp.f32 %v982_v57  ;;  %v2426_v4 = vmul.f32 0.70710677, %v2410_v32 }
 0x5d2   :  { %v1083_v50 = vmul.f32 %v2376_v20, %v1067_v39  ;;  %v1095_v35 = vadd.f32 -0.28449672, %v1079_v16  ;;  %v1204_v19 = vmul.f32 1.442695, %v1177_v0  ;;  %1821 = vrcp.f32 %v986_v48 }
 0x5d3   :  { %1417 = vmatpush1.bf16.msra.mxu1 %v1304_v12  ;;  %v2431_v54 = vmul.f32 0.70710677, %v2417_v5  ;;  %v2434_v28 = vand.u32 2147483647, %v2426_v4  ;;  %v939_v52 = vsel %vm923_vm13, 1.0, %v1866_v60  ;;  %v1158_v2 = vsub.f32 0.0, %v2400_v61 }
 0x5d4   :  { %v1099_v26 = vadd.f32 -0.28449672, %v1083_v50  ;;  %v1111_v27 = vmul.f32 %v2369_v37, %v1095_v35  ;;  %v2413_v13 = vpop.eup %1811  ;;  %v1212_v56 = vmul.f32 1.442695, %v1181_v36  ;;  %1823 = vpow2.f32 %v1204_v19 }
 0x5d5   :  { %v1017_v33 = vmul.f32 1.0614054, %v2413_v13  ;;  %v2445_v53 = vand.u32 2147483647, %v2431_v54  ;;  %v968_v3 = vmul.f32 0.3275911, %v2434_v28 }
 0x5d6   :  { %v1115_v43 = vmul.f32 %v2376_v20, %v1099_v26  ;;  %v1127_v24 = vadd.f32 0.2548296, %v1111_v27  ;;  %v2422_v6 = vpop.eup %1813  ;;  %1825 = vpow2.f32 %v1212_v56  ;;  %v1162_v39 = vsub.f32 0.0, %v2403_v62 }
 0x5d7   :  { %v1021_v17 = vmul.f32 1.0614054, %v2422_v6  ;;  %v1033_v15 = vadd.f32 -1.4531521, %v1017_v33  ;;  %v1816_v47 = vpop.eup %1815  ;;  %v972_v40 = vmul.f32 0.3275911, %v2445_v53  ;;  %v1174_v27 = vmul.f32 %v1158_v2, %v2400_v61 }
 0x5d8   :  { %v1131_v8 = vadd.f32 0.2548296, %v1115_v43  ;;  %v1143_v10 = vmul.f32 %v2369_v37, %v1127_v24  ;;  %v1818_v23 = vpop.eup %1817  ;;  %v935_v37 = vsel %vm919_vm12, 1.0, %v1866_v60  ;;  %v984_v16 = vadd.f32 1.0, %v968_v3 }
 0x5d9   :  { %v1037_v30 = vadd.f32 -1.4531521, %v1021_v17  ;;  %v1049_v25 = vmul.f32 %v2413_v13, %v1033_v15  ;;  %v988_v22 = vadd.f32 1.0, %v972_v40  ;;  %v887_v26 = vmul.f32 0.5, %v2267_v14 }
 0x5da   :  { %v1147_v49 = vmul.f32 %v2376_v20, %v1131_v8  ;;  %v1223_v29 = vmul.f32 %v1816_v47, %v1143_v10  ;;  %1827 = vrcp.f32 %v984_v16  ;;  %v891_v0 = vmul.f32 0.5, %v2276_v46 }
 0x5db   :  { %v1053_v20 = vmul.f32 %v2422_v6, %v1037_v30  ;;  %v1065_v38 = vadd.f32 1.4214138, %v1049_v25  ;;  %v2454_v18 = vpop.eup %1819  ;;  %v1178_v8 = vmul.f32 %v1162_v39, %v2403_v62  ;;  %1829 = vrcp.f32 %v988_v22 }
 0x5dc   :  { %v1227_v45 = vmul.f32 %v1818_v23, %v1147_v49  ;;  %v1239_v7 = vsub.f32 1.0, %v1223_v29  ;;  %v2460_v24 = vpop.eup %1821  ;;  %v1014_v36 = vmul.f32 1.0614054, %v2454_v18  ;;  %v1198_v46 = vmul.f32 1.442695, %v1174_v27 }
 0x5dd   :  { %v1069_v63 = vadd.f32 1.4214138, %v1053_v20  ;;  %v1081_v12 = vmul.f32 %v2413_v13, %v1065_v38  ;;  %v1018_v61 = vmul.f32 1.0614054, %v2460_v24  ;;  %v1206_v23 = vmul.f32 1.442695, %v1178_v8 }
 0x5de   :  { %v1243_v21 = vsub.f32 1.0, %v1227_v45  ;;  %v1255_v59 = vmul.f32 %v1239_v7, %v935_v37  ;;  %v1030_v15 = vadd.f32 -1.4531521, %v1014_v36  ;;  %v1824_v30 = vpop.eup %1823  ;;  %v1160_v62 = vsub.f32 0.0, %v2434_v28 }
 0x5df   :  { %v1085_v34 = vmul.f32 %v2422_v6, %v1069_v63  ;;  %v1097_v44 = vadd.f32 -0.28449672, %v1081_v12  ;;  %v1034_v29 = vadd.f32 -1.4531521, %v1018_v61  ;;  %vm921_vm14 = vcmp.ge.f32.partialorder %v2359_v9, 0.0 }
 0x5e0   :  { %v1259_v50 = vmul.f32 %v1243_v21, %v939_v52  ;;  %v1271_v35 = vadd.f32 1.0, %v1255_v59  ;;  %v1046_v25 = vmul.f32 %v2454_v18, %v1030_v15  ;;  %v1826_v45 = vpop.eup %1825  ;;  %vm925_vm15 = vcmp.ge.f32.partialorder %v2364_v55, 0.0 }
 0x5e1   :  { %v1101_v48 = vadd.f32 -0.28449672, %v1085_v34  ;;  %v1113_v43 = vmul.f32 %v2413_v13, %v1097_v44  ;;  %v1050_v56 = vmul.f32 %v2460_v24, %v1034_v29  ;;  %1831 = vpow2.f32 %v1198_v46 }
 0x5e2   :  { %v1275_v57 = vadd.f32 1.0, %v1259_v50  ;;  %v1287_v33 = vmul.f32 %v1271_v35, %v887_v26  ;;  %v1062_v7 = vadd.f32 1.4214138, %v1046_v25  ;;  %v937_v40 = vsel %vm921_vm14, 1.0, %v1866_v60 }
 0x5e3   :  { %v1117_v14 = vmul.f32 %v2422_v6, %v1101_v48  ;;  %v1129_v17 = vadd.f32 0.2548296, %v1113_v43  ;;  %v1066_v2 = vadd.f32 1.4214138, %v1050_v56  ;;  %1833 = vpow2.f32 %v1206_v23 }
 0x5e4   :  { %v1291_v10 = vmul.f32 %v1275_v57, %v891_v0  ;;  %v2474_v3 = vpop.eup %1827  ;;  %v1078_v9 = vmul.f32 %v2454_v18, %v1062_v7  ;;  %v941_v16 = vsel %vm925_vm15, 1.0, %v1866_v60  ;;  %v893_v27 = vmul.f32 0.5, %v2354_v41 }
 0x5e5   :  { %v1133_v19 = vadd.f32 0.2548296, %v1117_v14  ;;  %v1145_v49 = vmul.f32 %v2413_v13, %v1129_v17  ;;  %v1164_v13 = vsub.f32 0.0, %v2445_v53  ;;  %v1082_v63 = vmul.f32 %v2460_v24, %v1066_v2  ;;  %v1830_v39 = vpop.eup %1829 }
 0x5e6   :  { %v1307_v47 = vpack.c.bf16 %v1291_v10, %v1287_v33  ;;  %v1016_v12 = vmul.f32 1.0614054, %v2474_v3  ;;  %v1094_v22 = vadd.f32 -0.28449672, %v1078_v9  ;;  %v1020_v26 = vmul.f32 1.0614054, %v1830_v39 }
 0x5e7   :  { %v1149_v37 = vmul.f32 %v2422_v6, %v1133_v19  ;;  %v1225_v52 = vmul.f32 %v1824_v30, %v1145_v49  ;;  %v1176_v6 = vmul.f32 %v1160_v62, %v2434_v28  ;;  %v1180_v50 = vmul.f32 %v1164_v13, %v2445_v53 }
 0x5e8   :  { %1345 = vmatprep.subr.bf16.mxu0 %v1307_v47  ;;  %v1098_v44 = vadd.f32 -0.28449672, %v1082_v63  ;;  %v889_v28 = vmul.f32 0.5, %v2347_v58  ;;  %v1110_v0 = vmul.f32 %v2454_v18, %v1094_v22  ;;  %v1032_v57 = vadd.f32 -1.4531521, %v1016_v12 }
 0x5e9   :  { %v1229_v20 = vmul.f32 %v1826_v45, %v1149_v37  ;;  %v1241_v38 = vsub.f32 1.0, %v1225_v52  ;;  %v1036_v33 = vadd.f32 -1.4531521, %v1020_v26  ;;  %v1202_v55 = vmul.f32 1.442695, %v1176_v6 }
 0x5ea   :  { %v1114_v43 = vmul.f32 %v2460_v24, %v1098_v44  ;;  %v1126_v36 = vadd.f32 0.2548296, %v1110_v0  ;;  %v1048_v8 = vmul.f32 %v2474_v3, %v1032_v57  ;;  %v1210_v53 = vmul.f32 1.442695, %v1180_v50 }
 0x5eb   :  { %v1245_v21 = vsub.f32 1.0, %v1229_v20  ;;  %v1257_v59 = vmul.f32 %v1241_v38, %v937_v40  ;;  %v1052_v61 = vmul.f32 %v1830_v39, %v1036_v33  ;;  %v1832_v41 = vpop.eup %1831  ;;  %1835 = vpow2.f32 %v1202_v55 }
 0x5ec   :  { %v1130_v17 = vadd.f32 0.2548296, %v1114_v43  ;;  %v1142_v58 = vmul.f32 %v2454_v18, %v1126_v36  ;;  %v1064_v15 = vadd.f32 1.4214138, %v1048_v8  ;;  %vm918_vm1 = vcmp.ge.f32.partialorder %v2393_v31, 0.0 }
 0x5ed   :  { %v1261_v35 = vmul.f32 %v1245_v21, %v941_v16  ;;  %v1273_v34 = vadd.f32 1.0, %v1257_v59  ;;  %v1068_v19 = vadd.f32 1.4214138, %v1052_v61  ;;  %v1834_v49 = vpop.eup %1833  ;;  %1837 = vpow2.f32 %v1210_v53 }
 0x5ee   :  { %v1146_v47 = vmul.f32 %v2460_v24, %v1130_v17  ;;  %v1222_v29 = vmul.f32 %v1832_v41, %v1142_v58  ;;  %v1080_v30 = vmul.f32 %v2474_v3, %v1064_v15  ;;  %vm922_vm0 = vcmp.ge.f32.partialorder %v2396_v51, 0.0 }
 0x5ef   :  { %v1277_v48 = vadd.f32 1.0, %v1261_v35  ;;  %v1289_v10 = vmul.f32 %v1273_v34, %v889_v28  ;;  %v1084_v23 = vmul.f32 %v1830_v39, %v1068_v19  ;;  %v934_v37 = vsel %vm918_vm1, 1.0, %v1866_v60 }
 0x5f0   :  { %v1226_v25 = vmul.f32 %v1834_v49, %v1146_v47  ;;  %v1238_v18 = vsub.f32 1.0, %v1222_v29  ;;  %v1096_v62 = vadd.f32 -0.28449672, %v1080_v30  ;;  %v938_v56 = vsel %vm922_vm0, 1.0, %v1866_v60 }
 0x5f1   :  { %v1293_v14 = vmul.f32 %v1277_v48, %v893_v27  ;;  %v1100_v24 = vadd.f32 -0.28449672, %v1084_v23  ;;  %v886_v2 = vmul.f32 0.5, %v2383_v42  ;;  %v890_v51 = vmul.f32 0.5, %v2389_v11  ;;  %v1727_v42 = vld [vmem:[%s2623_s4] sm:$0xff]   ;;  %v1728_v48 = vld [vmem:[%s2623_s4 + $0x8] sm:$0xff]  }
 0x5f2   :  { %v1242_v52 = vsub.f32 1.0, %v1226_v25  ;;  %v1254_v45 = vmul.f32 %v1238_v18, %v934_v37  ;;  %v1112_v31 = vmul.f32 %v2474_v3, %v1096_v62  ;;  %vm920_vm2 = vcmp.ge.f32.partialorder %v2426_v4, 0.0 }
 0x5f3   :  { %v1309_v46 = vpack.c.bf16 %v1293_v14, %v1289_v10  ;;  %v1116_v13 = vmul.f32 %v1830_v39, %v1100_v24  ;;  %vm924_vm3 = vcmp.ge.f32.partialorder %v2431_v54, 0.0  ;;  %v936_v11 = vsel %vm920_vm2, 1.0, %v1866_v60 }
 0x5f4   :  { %v1258_v7 = vmul.f32 %v1242_v52, %v938_v56  ;;  %v1270_v20 = vadd.f32 1.0, %v1254_v45  ;;  %v1128_v38 = vadd.f32 0.2548296, %v1112_v31  ;;  %vm1330_vm4 = vcmask 261120  }
 0x5f5   :  { %1418 = vmatprep.subr.bf16.mxu1 %v1309_v46  ;;  %v1132_v9 = vadd.f32 0.2548296, %v1116_v13  ;;  %v1836_v21 = vpop.eup %1835  ;;  %v888_v54 = vmul.f32 0.5, %v2410_v32  ;;  %v892_v28 = vmul.f32 0.5, %v2417_v5  ;;  %v1730_v32 = vld [vmem:[%s2623_s4 + $0x18] sm:$0xff]   ;;  %vm1553_vm5 = vcmask 523264  }
 0x5f6   :  { %v1274_v40 = vadd.f32 1.0, %v1258_v7  ;;  %v1144_v6 = vmul.f32 %v2474_v3, %v1128_v38  ;;  %v1286_v59 = vmul.f32 %v1270_v20, %v886_v2 }
 0x5f7   :  { %v1148_v12 = vmul.f32 %v1830_v39, %v1132_v9  ;;  %v1838_v16 = vpop.eup %1837  ;;  %v940_v39 = vsel %vm924_vm3, 1.0, %v1866_v60  ;;  %v1729_v60 = vld [vmem:[%s2623_s4 + $0x10] sm:$0xff]   ;;  %s1867_s4 = smov 64  }
 0x5f8   :  { %v1290_v63 = vmul.f32 %v1274_v40, %v890_v51  ;;  %v1224_v22 = vmul.f32 %v1836_v21, %v1144_v6 }
 0x5f9   :  { %v1228_v35 = vmul.f32 %v1838_v16, %v1148_v12 }
 0x5fa   :  { %v1306_v50 = vpack.c.bf16 %v1290_v63, %v1286_v59  ;;  %v1240_v34 = vsub.f32 1.0, %v1224_v22 }
 0x5fb   :  { %v1244_v3 = vsub.f32 1.0, %v1228_v35 }
 0x5fc   :  { %1346 = vmatpush1.bf16.msra.mxu0 %v1306_v50  ;;  %v1256_v44 = vmul.f32 %v1240_v34, %v936_v11 }
 0x5fd   :  { %v1260_v26 = vmul.f32 %v1244_v3, %v940_v39 }
 0x5fe   :  { %v1272_v4 = vadd.f32 1.0, %v1256_v44 }
 0x5ff   :  { %1703 = vmatmul.mubr.msk.bf16.vlgmr.msra.gmra.mrb[16].mxu0 %vm1330_vm4, %v1727_v42  ;;  %v1276_v27 = vadd.f32 1.0, %v1260_v26 }
 0x600   :  { %1385 = vmatprep.mubr.bf16.mxu0 %v1864_v1  ;;  %v1288_v0 = vmul.f32 %v1272_v4, %v888_v54 }
 0x601   :  { %v1292_v57 = vmul.f32 %v1276_v27, %v892_v28 }
 0x603   :  { %v1308_v43 = vpack.c.bf16 %v1292_v57, %v1288_v0 }
 0x605   :  { %1419 = vmatpush1.bf16.msra.mxu1 %v1308_v43 }
 0x607   :  { %1704 = vmatmul.mubr.msk.bf16.gmra.mrb[20].mxu0 %vm1330_vm4, %v1728_v48 }
 0x608   :  { %1395 = vmatprep.mubr.bf16.mxu0 %v1864_v1  ;;  %1707 = vmatmul.mubr.msk.bf16.vlgmr.msra.gmra.mrb[16].mxu1 %vm1330_vm4, %v1727_v42 }
 0x609   :  { %1458 = vmatprep.mubr.bf16.mxu1 %v1864_v1 }
 0x60f   :  { %1705 = vmatmul.mubr.msk.bf16.gmra.mrb[24].mxu0 %vm1330_vm4, %v1729_v60 }
 0x610   :  { %1405 = vmatprep.mubr.bf16.mxu0 %v1864_v1  ;;  %1708 = vmatmul.mubr.msk.bf16.gmra.mrb[20].mxu1 %vm1330_vm4, %v1728_v48 }
 0x611   :  { %1468 = vmatprep.mubr.bf16.mxu1 %v1864_v1 }
 0x617   :  { %1706 = vmatmul.mubr.msk.bf16.gmra.mrb[28].mxu0 %vm1330_vm4, %v1730_v32 }
 0x618   :  { %1709 = vmatmul.mubr.msk.bf16.gmra.mrb[24].mxu1 %vm1330_vm4, %v1729_v60 }
 0x619   :  { %1478 = vmatprep.mubr.bf16.mxu1 %v1864_v1 }
 0x620   :  { %1710 = vmatmul.mubr.msk.bf16.gmra.mrb[28].mxu1 %vm1330_vm4, %v1730_v32 }
 0x6d2   :  { %v1377_v5 = vpop.f32.mrb[16].mxu0 }
 0x6d3   :  { %v1379_v33 = vpop.f32.mrb[17].mxu0 }
 0x6d4   :  { %v1381_v55 = vpop.f32.mrb[18].mxu0 }
 0x6d5   :  { %v1383_v36 = vpop.f32.mrb[19].mxu0 }
 0x6da   :  { %v1387_v8 = vpop.f32.mrb[20].mxu0 }
 0x6db   :  { %v1389_v53 = vpop.f32.mrb[21].mxu0  ;;  %v1450_v10 = vpop.f32.mrb[16].mxu1 }
 0x6dc   :  { %v1391_v14 = vpop.f32.mrb[22].mxu0  ;;  %v1489_v17 = vmax.f32 %v1377_v5, %v1450_v10  ;;  %v1452_v61 = vpop.f32.mrb[17].mxu1 }
 0x6dd   :  { %v1393_v58 = vpop.f32.mrb[23].mxu0  ;;  %v1490_v15 = vmax.f32 %v1379_v33, %v1452_v61  ;;  %v1454_v41 = vpop.f32.mrb[18].mxu1 }
 0x6de   :  { %v1491_v46 = vmax.f32 %v1381_v55, %v1454_v41  ;;  %v1456_v47 = vpop.f32.mrb[19].mxu1 }
 0x6df   :  { %v1505_v19 = vmax.f32 %v1489_v17, %v1490_v15  ;;  %v1492_v49 = vmax.f32 %v1383_v36, %v1456_v47 }
 0x6e1   :  { %v1506_v1 = vmax.f32 %v1491_v46, %v1492_v49  ;;  %1521 = vrot.lane.b32.xlu0 %v1505_v19, %s1867_s4 }
 0x6e2   :  { %v1397_v29 = vpop.f32.mrb[24].mxu0 }
 0x6e3   :  { %v1399_v30 = vpop.f32.mrb[25].mxu0  ;;  %v1460_v25 = vpop.f32.mrb[20].mxu1  ;;  %1523 = vrot.lane.b32.xlu1 %v1506_v1, %s1867_s4 }
 0x6e4   :  { %v1401_v23 = vpop.f32.mrb[26].mxu0  ;;  %v1493_v18 = vmax.f32 %v1387_v8, %v1460_v25  ;;  %v1462_v62 = vpop.f32.mrb[21].mxu1 }
 0x6e5   :  { %v1403_v37 = vpop.f32.mrb[27].mxu0  ;;  %v1494_v52 = vmax.f32 %v1389_v53, %v1462_v62  ;;  %v1464_v24 = vpop.f32.mrb[22].mxu1 }
 0x6e6   :  { %v1495_v56 = vmax.f32 %v1391_v14, %v1464_v24  ;;  %v1466_v45 = vpop.f32.mrb[23].mxu1 }
 0x6e7   :  { %v1507_v31 = vmax.f32 %v1493_v18, %v1494_v52  ;;  %v1496_v7 = vmax.f32 %v1393_v58, %v1466_v45 }
 0x6e9   :  { %v1508_v13 = vmax.f32 %v1495_v56, %v1496_v7  ;;  %1525 = vrot.lane.b32.xlu1 %v1507_v31, %s1867_s4 }
 0x6ea   :  { %v1407_v20 = vpop.f32.mrb[28].mxu0 }
 0x6eb   :  { %v1409_v38 = vpop.f32.mrb[29].mxu0  ;;  %v1470_v2 = vpop.f32.mrb[24].mxu1 }
 0x6ec   :  { %v1411_v51 = vpop.f32.mrb[30].mxu0  ;;  %v1497_v40 = vmax.f32 %v1397_v29, %v1470_v2  ;;  %v1472_v9 = vpop.f32.mrb[25].mxu1 }
 0x6ed   :  { %v1413_v6 = vpop.f32.mrb[31].mxu0  ;;  %v1498_v21 = vmax.f32 %v1399_v30, %v1472_v9  ;;  %v1474_v59 = vpop.f32.mrb[26].mxu1  ;;  %1527 = vrot.lane.b32.xlu1 %v1508_v13, %s1867_s4 }
 0x6ee   :  { %v1499_v63 = vmax.f32 %v1401_v23, %v1474_v59  ;;  %v1476_v12 = vpop.f32.mrb[27].mxu1 }
 0x6ef   :  { %v1509_v16 = vmax.f32 %v1497_v40, %v1498_v21  ;;  %v1500_v22 = vmax.f32 %v1403_v37, %v1476_v12 }
 0x6f1   :  { %v1510_v50 = vmax.f32 %v1499_v63, %v1500_v22  ;;  %1529 = vrot.lane.b32.xlu0 %v1509_v16, %s1867_s4 }
 0x6f3   :  { %v1480_v35 = vpop.f32.mrb[28].mxu1  ;;  %1531 = vrot.lane.b32.xlu1 %v1510_v50, %s1867_s4 }
 0x6f4   :  { %v1501_v34 = vmax.f32 %v1407_v20, %v1480_v35  ;;  %v1482_v42 = vpop.f32.mrb[29].mxu1 }
 0x6f5   :  { %v1502_v11 = vmax.f32 %v1409_v38, %v1482_v42  ;;  %v1484_v3 = vpop.f32.mrb[30].mxu1 }
 0x6f6   :  { %v1503_v39 = vmax.f32 %v1411_v51, %v1484_v3  ;;  %v1486_v44 = vpop.f32.mrb[31].mxu1 }
 0x6f7   :  { %v1511_v26 = vmax.f32 %v1501_v34, %v1502_v11  ;;  %v1504_v4 = vmax.f32 %v1413_v6, %v1486_v44 }
 0x6f9   :  { %v1512_v54 = vmax.f32 %v1503_v39, %v1504_v4  ;;  %1533 = vrot.lane.b32.xlu0 %v1511_v26, %s1867_s4 }
 0x6fb   :  { %1535 = vrot.lane.b32.xlu1 %v1512_v54, %s1867_s4 }
 0x753   :  { %v1522_v28 = vpop.permute.xlu0 %1521 }
 0x754   :  { %v1545_v27 = vmax.f32 %v1505_v19, %v1522_v28 }
 0x755   :  { %v1524_v0 = vpop.permute.xlu1 %1523 }
 0x756   :  { %v1546_v57 = vmax.f32 %v1506_v1, %v1524_v0  ;;  %v1554_v48 = vsel %vm1553_vm5, %v1545_v27, 0.0 }
 0x757   :  { %1555 = vadd.xlane.f32.xlu0 %v1554_v48 }
 0x758   :  { %v1557_v43 = vsel %vm1553_vm5, %v1546_v57, 0.0 }
 0x759   :  { %1558 = vadd.xlane.f32.xlu1 %v1557_v43 }
 0x75b   :  { %v1526_v60 = vpop.permute.xlu1 %1525 }
 0x75c   :  { %v1547_v32 = vmax.f32 %v1507_v31, %v1526_v60 }
 0x75e   :  { %v1560_v5 = vsel %vm1553_vm5, %v1547_v32, 0.0 }
 0x75f   :  { %v1528_v33 = vpop.permute.xlu1 %1527  ;;  %1561 = vadd.xlane.f32.xlu0 %v1560_v5 }
 0x760   :  { %v1548_v55 = vmax.f32 %v1508_v13, %v1528_v33 }
 0x762   :  { %v1563_v36 = vsel %vm1553_vm5, %v1548_v55, 0.0 }
 0x763   :  { %v1530_v8 = vpop.permute.xlu0 %1529  ;;  %1564 = vadd.xlane.f32.xlu0 %v1563_v36 }
 0x764   :  { %v1549_v53 = vmax.f32 %v1509_v16, %v1530_v8 }
 0x765   :  { %v1532_v10 = vpop.permute.xlu1 %1531 }
 0x766   :  { %v1550_v14 = vmax.f32 %v1510_v50, %v1532_v10  ;;  %v1566_v17 = vsel %vm1553_vm5, %v1549_v53, 0.0 }
 0x767   :  { %1567 = vadd.xlane.f32.xlu0 %v1566_v17 }
 0x768   :  { %v1569_v61 = vsel %vm1553_vm5, %v1550_v14, 0.0 }
 0x769   :  { %1570 = vadd.xlane.f32.xlu1 %v1569_v61 }
 0x76b   :  { %v1534_v58 = vpop.permute.xlu0 %1533 }
 0x76c   :  { %v1551_v15 = vmax.f32 %v1511_v26, %v1534_v58 }
 0x76d   :  { %v1536_v41 = vpop.permute.xlu1 %1535 }
 0x76e   :  { %v1552_v46 = vmax.f32 %v1512_v54, %v1536_v41  ;;  %v1572_v47 = vsel %vm1553_vm5, %v1551_v15, 0.0 }
 0x76f   :  { %1573 = vadd.xlane.f32.xlu0 %v1572_v47 }
 0x770   :  { %v1575_v19 = vsel %vm1553_vm5, %v1552_v46, 0.0 }
 0x771   :  { %1576 = vadd.xlane.f32.xlu1 %v1575_v19 }
 0x7e4   :  { %v1556_v49 = vpop.xlane.xlu0 %1555 }
 0x7e5   :  { %v1579_v1 = vmul.f32 0.015625, %v1556_v49 }
 0x7e6   :  { %v1559_v29 = vpop.xlane.xlu1 %1558 }
 0x7e7   :  { %v1587_v30 = vsub.f32 %v1545_v27, %v1579_v1  ;;  %v1580_v25 = vmul.f32 0.015625, %v1559_v29 }
 0x7e9   :  { %v1588_v23 = vsub.f32 %v1546_v57, %v1580_v25  ;;  %v1595_v18 = vmul.f32 %v1587_v30, %v1587_v30  ;;  %v1635_v36 = vmul.f32 0.8, %v1587_v30 }
 0x7eb   :  { %v1603_v62 = vsel %vm1553_vm5, %v1595_v18, 0.0  ;;  %v1596_v37 = vmul.f32 %v1588_v23, %v1588_v23  ;;  %v1636_v10 = vmul.f32 0.8, %v1588_v23 }
 0x7ec   :  { %1604 = vadd.xlane.f32.xlu0 %v1603_v62  ;;  %v1562_v52 = vpop.xlane.xlu0 %1561 }
 0x7ed   :  { %v1581_v24 = vmul.f32 0.015625, %v1562_v52  ;;  %v1606_v56 = vsel %vm1553_vm5, %v1596_v37, 0.0 }
 0x7ee   :  { %1607 = vadd.xlane.f32.xlu1 %v1606_v56 }
 0x7ef   :  { %v2551_v45 = vsub.f32 %v1547_v32, %v1581_v24 }
 0x7f0   :  { %v1565_v31 = vpop.xlane.xlu0 %1564 }
 0x7f1   :  { %v1582_v7 = vmul.f32 0.015625, %v1565_v31  ;;  %v1597_v13 = vmul.f32 %v2551_v45, %v2551_v45  ;;  %v1637_v49 = vmul.f32 0.8, %v2551_v45 }
 0x7f3   :  { %v2555_v20 = vsub.f32 %v1548_v55, %v1582_v7  ;;  %v1609_v38 = vsel %vm1553_vm5, %v1597_v13, 0.0 }
 0x7f4   :  { %1610 = vadd.xlane.f32.xlu0 %v1609_v38  ;;  %v1568_v2 = vpop.xlane.xlu0 %1567 }
 0x7f5   :  { %v1583_v51 = vmul.f32 0.015625, %v1568_v2  ;;  %v1598_v40 = vmul.f32 %v2555_v20, %v2555_v20  ;;  %v1638_v23 = vmul.f32 0.8, %v2555_v20 }
 0x7f6   :  { %v1571_v9 = vpop.xlane.xlu1 %1570 }
 0x7f7   :  { %v2560_v6 = vsub.f32 %v1549_v53, %v1583_v51  ;;  %v1584_v21 = vmul.f32 0.015625, %v1571_v9  ;;  %v1612_v59 = vsel %vm1553_vm5, %v1598_v40, 0.0 }
 0x7f8   :  { %1613 = vadd.xlane.f32.xlu1 %v1612_v59 }
 0x7f9   :  { %v2563_v63 = vsub.f32 %v1550_v14, %v1584_v21  ;;  %v1599_v12 = vmul.f32 %v2560_v6, %v2560_v6  ;;  %v1639_v45 = vmul.f32 0.8, %v2560_v6 }
 0x7fb   :  { %v1615_v16 = vsel %vm1553_vm5, %v1599_v12, 0.0  ;;  %v1600_v22 = vmul.f32 %v2563_v63, %v2563_v63  ;;  %v1640_v7 = vmul.f32 0.8, %v2563_v63 }
 0x7fc   :  { %1616 = vadd.xlane.f32.xlu0 %v1615_v16  ;;  %v1574_v50 = vpop.xlane.xlu0 %1573 }
 0x7fd   :  { %v1585_v35 = vmul.f32 0.015625, %v1574_v50  ;;  %v1618_v34 = vsel %vm1553_vm5, %v1600_v22, 0.0 }
 0x7fe   :  { %1619 = vadd.xlane.f32.xlu1 %v1618_v34  ;;  %v1577_v42 = vpop.xlane.xlu1 %1576 }
 0x7ff   :  { %v2571_v11 = vsub.f32 %v1551_v15, %v1585_v35  ;;  %v1586_v3 = vmul.f32 0.015625, %v1577_v42 }
 0x801   :  { %v2573_v39 = vsub.f32 %v1552_v46, %v1586_v3  ;;  %v1601_v44 = vmul.f32 %v2571_v11, %v2571_v11  ;;  %v1641_v2 = vmul.f32 0.8, %v2571_v11 }
 0x803   :  { %v1621_v26 = vsel %vm1553_vm5, %v1601_v44, 0.0  ;;  %v1602_v4 = vmul.f32 %v2573_v39, %v2573_v39  ;;  %v1642_v40 = vmul.f32 0.8, %v2573_v39 }
 0x804   :  { %1622 = vadd.xlane.f32.xlu0 %v1621_v26 }
 0x805   :  { %v1624_v54 = vsel %vm1553_vm5, %v1602_v4, 0.0 }
 0x806   :  { %1625 = vadd.xlane.f32.xlu1 %v1624_v54 }
 0x879   :  { %v1605_v28 = vpop.xlane.xlu0 %1604 }
 0x87a   :  { %v1627_v27 = vmul.f32 0.015625, %v1605_v28 }
 0x87b   :  { %v1608_v0 = vpop.xlane.xlu1 %1607 }
 0x87c   :  { %v1643_v57 = vadd.f32 1e-05, %v1627_v27  ;;  %v1628_v48 = vmul.f32 0.015625, %v1608_v0 }
 0x87e   :  { %1839 = vrsqrt.f32 %v1643_v57  ;;  %v1644_v43 = vadd.f32 1e-05, %v1628_v48 }
 0x880   :  { %1841 = vrsqrt.f32 %v1644_v43 }
 0x881   :  { %v1611_v60 = vpop.xlane.xlu0 %1610 }
 0x882   :  { %v1629_v32 = vmul.f32 0.015625, %v1611_v60 }
 0x884   :  { %v1645_v5 = vadd.f32 1e-05, %v1629_v32 }
 0x885   :  { %v1614_v33 = vpop.xlane.xlu1 %1613 }
 0x886   :  { %1843 = vrsqrt.f32 %v1645_v5  ;;  %v1630_v55 = vmul.f32 0.015625, %v1614_v33 }
 0x888   :  { %v1840_v8 = vpop.eup %1839  ;;  %v1646_v53 = vadd.f32 1e-05, %v1630_v55 }
 0x889   :  { %v1659_v14 = vmul.f32 %v1840_v8, %v1635_v36  ;;  %v1617_v17 = vpop.xlane.xlu0 %1616 }
 0x88a   :  { %v1842_v61 = vpop.eup %1841  ;;  %1845 = vrsqrt.f32 %v1646_v53  ;;  %v1631_v58 = vmul.f32 0.015625, %v1617_v17 }
 0x88b   :  { %1667 = vst.msk [vmem:[%s2624_s5] sm:$0xff] %vm1553_vm5, %v1659_v14  ;;  %v1660_v15 = vmul.f32 %v1842_v61, %v1636_v10  ;;  %v1620_v41 = vpop.xlane.xlu1 %1619 }
 0x88c   :  { %v1647_v46 = vadd.f32 1e-05, %v1631_v58  ;;  %v1632_v47 = vmul.f32 0.015625, %v1620_v41 }
 0x88d   :  { %1668 = vst.msk [vmem:[%s2624_s5 + $0x8] sm:$0xff] %vm1553_vm5, %v1660_v15 }
 0x88e   :  { %1847 = vrsqrt.f32 %v1647_v46  ;;  %v1648_v19 = vadd.f32 1e-05, %v1632_v47 }
 0x890   :  { %v1844_v1 = vpop.eup %1843  ;;  %1849 = vrsqrt.f32 %v1648_v19 }
 0x891   :  { %v1661_v29 = vmul.f32 %v1844_v1, %v1637_v49  ;;  %v1623_v30 = vpop.xlane.xlu0 %1622 }
 0x892   :  { %v1633_v25 = vmul.f32 0.015625, %v1623_v30 }
 0x893   :  { %1669 = vst.msk [vmem:[%s2624_s5 + $0x10] sm:$0xff] %vm1553_vm5, %v1661_v29  ;;  %v1626_v18 = vpop.xlane.xlu1 %1625 }
 0x894   :  { %v1846_v62 = vpop.eup %1845  ;;  %v1649_v37 = vadd.f32 1e-05, %v1633_v25  ;;  %v1634_v52 = vmul.f32 0.015625, %v1626_v18 }
 0x895   :  { %v1662_v24 = vmul.f32 %v1846_v62, %v1638_v23 }
 0x896   :  { %1851 = vrsqrt.f32 %v1649_v37  ;;  %v1650_v56 = vadd.f32 1e-05, %v1634_v52 }
 0x897   :  { %1670 = vst.msk [vmem:[%s2624_s5 + $0x18] sm:$0xff] %vm1553_vm5, %v1662_v24 }
 0x898   :  { %v1848_v31 = vpop.eup %1847  ;;  %1853 = vrsqrt.f32 %v1650_v56 }
 0x899   :  { %v1663_v13 = vmul.f32 %v1848_v31, %v1639_v45 }
 0x89a   :  { %v1850_v20 = vpop.eup %1849 }
 0x89b   :  { %1671 = vst.msk [vmem:[%s2624_s5 + $0x20] sm:$0xff] %vm1553_vm5, %v1663_v13  ;;  %v1664_v38 = vmul.f32 %v1850_v20, %v1640_v7 }
 0x89d   :  { %1672 = vst.msk [vmem:[%s2624_s5 + $0x28] sm:$0xff] %vm1553_vm5, %v1664_v38 }
 0x8a0   :  { %v1852_v51 = vpop.eup %1851 }
 0x8a1   :  { %v1665_v9 = vmul.f32 %v1852_v51, %v1641_v2 }
 0x8a2   :  { %v1854_v6 = vpop.eup %1853 }
 0x8a3   :  { %1673 = vst.msk [vmem:[%s2624_s5 + $0x30] sm:$0xff] %vm1553_vm5, %v1665_v9  ;;  %v1666_v21 = vmul.f32 %v1854_v6, %v1642_v40 }
 0x8a5   :  { %1674 = vst.msk [vmem:[%s2624_s5 + $0x38] sm:$0xff] %vm1553_vm5, %v1666_v21 }

</bundles_post_ra>
